<compile_context>
chip_gen: v7x
topology: tpu7x:2x2x1
jax: 0.10.0
libtpu: 0.0.40
codegen_flags: <defaults>
</compile_context>

<pallas_src>
import jax
import jax.numpy as jnp
from jax.experimental import pallas as pl
from jax.experimental.pallas import tpu as pltpu

# Scoped-VMEM ceiling hint. Kept at 32 MiB: actual footprints here are a few
# MiB, and 32 MiB is within v7x's 64 MiB per-TC VMEM as well as v5e/v6e.
_VMEM_LIMIT = 32 * 1024 * 1024


# ----------------------------------------------------------------------------
# helpers
# ----------------------------------------------------------------------------

def _pick_tile(dim, target, mults=(128,)):
    """Largest tile <= target that divides `dim` and is a multiple of the first
    workable entry of `mults` (preference order), falling back to the full
    dimension (full-extent blocks are always legal)."""
    if dim <= target:
        return dim
    for mult in mults:
        t = (target // mult) * mult
        while t >= mult:
            if dim % t == 0:
                return t
            t -= mult
    return dim


def _gelu(x):
    # tanh-approximation GELU (as used in original BERT), computed in f32
    return 0.5 * x * (1.0 + jnp.tanh(0.7978845608028654 * (x + 0.044715 * x * x * x)))


def _ln(xv, g, b, eps):
    mean = jnp.mean(xv, axis=-1, keepdims=True)
    var = jnp.mean(jnp.square(xv - mean), axis=-1, keepdims=True)
    return (xv - mean) * jax.lax.rsqrt(var + eps) * g + b


# ----------------------------------------------------------------------------
# Pallas kernels
# ----------------------------------------------------------------------------

def pallas_linear(x, w, b, activation=None, out_dtype=None):
    """y = act(x @ w + b), tiled over (M, N, K) with an f32 VMEM accumulator.

    x: [M, K] (bf16 preferred), w: [K, N] (bf16 preferred), b: [N].
    """
    M, K = x.shape
    Kw, N = w.shape
    assert Kw == K
    out_dtype = out_dtype or x.dtype

    tm = _pick_tile(M, 512, (16, 8))          # bf16 packs 16 rows / sublane grp
    tn = _pick_tile(N, 512, (256, 128))       # 256-aligned for v6e/v7x MXU
    tk = _pick_tile(K, 512, (256, 128))
    grid = (M // tm, N // tn, K // tk)

    def kernel(x_ref, w_ref, b_ref, o_ref, acc_ref):
        kk = pl.program_id(2)

        @pl.when(kk == 0)
        def _init():
            acc_ref[...] = jnp.zeros_like(acc_ref)

        acc_ref[...] += jnp.dot(x_ref[...], w_ref[...],
                                preferred_element_type=jnp.float32)

        @pl.when(kk == pl.num_programs(2) - 1)
        def _finalize():
            y = acc_ref[...] + b_ref[...]
            if activation == "gelu":
                y = _gelu(y)
            elif activation == "tanh":
                y = jnp.tanh(y)
            o_ref[...] = y.astype(o_ref.dtype)

    # NOTE(v7x): "parallel" axes are eligible for cross-TensorCore sharding;
    # switch to pltpu.CORE_PARALLEL on the M axis if profiling shows a single
    # TC is used.
    return pl.pallas_call(
        kernel,
        out_shape=jax.ShapeDtypeStruct((M, N), out_dtype),
        grid=grid,
        in_specs=[pl.BlockSpec((tm, tk), lambda i, j, k: (i, k)),
                  pl.BlockSpec((tk, tn), lambda i, j, k: (k, j)),
                  pl.BlockSpec((1, tn), lambda i, j, k: (0, j))],
        out_specs=pl.BlockSpec((tm, tn), lambda i, j, k: (i, j)),
        scratch_shapes=[pltpu.VMEM((tm, tn), jnp.float32)],
        compiler_params=pltpu.CompilerParams(
            dimension_semantics=("parallel", "parallel", "arbitrary"),
            vmem_limit_bytes=_VMEM_LIMIT),
    )(x, w, b.reshape(1, N).astype(jnp.float32))


def pallas_linear_ln(x, w, b, residual, gamma, beta, eps=1e-12, out_dtype=None):
    """y = LayerNorm((x @ w + b) + residual), with bias, residual-add and
    LayerNorm fused into the matmul finalize.  tn = full N so every output
    row is complete when the last K-step runs; the residual / gamma / beta
    blocks are only DMA'd once per row-tile (their block index is constant
    over the K axis)."""
    M, K = x.shape
    Kw, N = w.shape
    assert Kw == K
    out_dtype = out_dtype or x.dtype

    tm = _pick_tile(M, 512, (16, 8))
    tk = _pick_tile(K, 512, (256, 128))
    grid = (M // tm, K // tk)

    def kernel(x_ref, w_ref, b_ref, r_ref, g_ref, bt_ref, o_ref, acc_ref):
        kk = pl.program_id(1)

        @pl.when(kk == 0)
        def _init():
            acc_ref[...] = jnp.zeros_like(acc_ref)

        acc_ref[...] += jnp.dot(x_ref[...], w_ref[...],
                                preferred_element_type=jnp.float32)

        @pl.when(kk == pl.num_programs(1) - 1)
        def _finalize():
            y = acc_ref[...] + b_ref[...] + r_ref[...].astype(jnp.float32)
            o_ref[...] = _ln(y, g_ref[...], bt_ref[...], eps).astype(o_ref.dtype)

    return pl.pallas_call(
        kernel,
        out_shape=jax.ShapeDtypeStruct((M, N), out_dtype),
        grid=grid,
        in_specs=[pl.BlockSpec((tm, tk), lambda i, k: (i, k)),
                  pl.BlockSpec((tk, N), lambda i, k: (k, 0)),
                  pl.BlockSpec((1, N), lambda i, k: (0, 0)),
                  pl.BlockSpec((tm, N), lambda i, k: (i, 0)),
                  pl.BlockSpec((1, N), lambda i, k: (0, 0)),
                  pl.BlockSpec((1, N), lambda i, k: (0, 0))],
        out_specs=pl.BlockSpec((tm, N), lambda i, k: (i, 0)),
        scratch_shapes=[pltpu.VMEM((tm, N), jnp.float32)],
        compiler_params=pltpu.CompilerParams(
            dimension_semantics=("parallel", "arbitrary"),
            vmem_limit_bytes=_VMEM_LIMIT),
    )(x, w, b.reshape(1, N).astype(jnp.float32), residual,
      gamma.reshape(1, N).astype(jnp.float32),
      beta.reshape(1, N).astype(jnp.float32))


def pallas_attention_fused(qkv, mask_add, *, B, S, H, nh):
    """Multi-head attention for one batch element per grid step.

    Reads q/k/v directly out of the fused projection qkv: [B*S, 3H] (bf16,
    q already pre-scaled by 1/sqrt(dh)), applies the additive mask
    mask_add: [B, 1, S] (f32), loops over heads in-kernel and writes a single
    lane-dense [B*S, H] context slab (heads merged before the store).
    """
    dh = H // nh

    def kernel(qkv_ref, m_ref, o_ref):
        slab = qkv_ref[...]                        # [S, 3H] bf16
        mv = m_ref[...].reshape(1, S)              # [1, S] f32 additive mask
        ctxs = []
        for h in range(nh):                        # static unroll over heads
            qh = slab[:, h * dh:(h + 1) * dh]              # [S, dh]
            kh = slab[:, H + h * dh:H + (h + 1) * dh]      # [S, dh]
            vh = slab[:, 2 * H + h * dh:2 * H + (h + 1) * dh]
            s = jnp.einsum("qd,kd->qk", qh, kh,
                           preferred_element_type=jnp.float32) + mv
            s = s - jnp.max(s, axis=-1, keepdims=True)
            p = jnp.exp(s)
            p = p * pl.reciprocal(jnp.sum(p, axis=-1, keepdims=True), approx=True)
            ctx = jnp.dot(p.astype(vh.dtype), vh,
                          preferred_element_type=jnp.float32)
            ctxs.append(ctx.astype(o_ref.dtype))
        o_ref[...] = jnp.concatenate(ctxs, axis=-1)        # one lane-dense store

    return pl.pallas_call(
        kernel,
        out_shape=jax.ShapeDtypeStruct((B * S, H), qkv.dtype),
        grid=(B,),
        in_specs=[pl.BlockSpec((S, 3 * H), lambda b: (b, 0)),
                  pl.BlockSpec((1, 1, S), lambda b: (b, 0, 0))],
        out_specs=pl.BlockSpec((S, H), lambda b: (b, 0)),
        compiler_params=pltpu.CompilerParams(
            dimension_semantics=("parallel",),
            vmem_limit_bytes=_VMEM_LIMIT),
    )(qkv, mask_add)


def pallas_layernorm(x, gamma, beta, eps=1e-12, out_dtype=None):
    """LayerNorm over the hidden dim, tiled over tokens (memory-bound; big
    row tile amortizes per-step overhead).  Stats in f32."""
    M, H = x.shape
    out_dtype = out_dtype or x.dtype
    tm = _pick_tile(M, 1024, (16, 8))
    grid = (M // tm,)

    def kernel(x_ref, g_ref, b_ref, o_ref):
        xv = x_ref[...].astype(jnp.float32)
        o_ref[...] = _ln(xv, g_ref[...], b_ref[...], eps).astype(o_ref.dtype)

    return pl.pallas_call(
        kernel,
        out_shape=jax.ShapeDtypeStruct((M, H), out_dtype),
        grid=grid,
        in_specs=[pl.BlockSpec((tm, H), lambda i: (i, 0)),
                  pl.BlockSpec((1, H), lambda i: (0, 0)),
                  pl.BlockSpec((1, H), lambda i: (0, 0))],
        out_specs=pl.BlockSpec((tm, H), lambda i: (i, 0)),
        compiler_params=pltpu.CompilerParams(
            dimension_semantics=("parallel",),
            vmem_limit_bytes=_VMEM_LIMIT),
    )(x, gamma.reshape(1, H).astype(jnp.float32),
      beta.reshape(1, H).astype(jnp.float32))


# ----------------------------------------------------------------------------
# Model: BERT encoder + pooler + classification head
# ----------------------------------------------------------------------------

def init_params(key, cfg):
    H, I, L = cfg["hidden"], cfg["intermediate"], cfg["layers"]
    V, P, T, C = cfg["vocab"], cfg["max_pos"], cfg["type_vocab"], cfg["classes"]

    def normal(k, shape):
        return (0.02 * jax.random.normal(k, shape)).astype(jnp.float32)

    keys = iter(jax.random.split(key, 8 + 8 * L))
    params = {
        "word_emb": normal(next(keys), (V, H)),
        "pos_emb": normal(next(keys), (P, H)),
        "type_emb": normal(next(keys), (T, H)),
        "emb_ln_g": jnp.ones((H,), jnp.float32),
        "emb_ln_b": jnp.zeros((H,), jnp.float32),
        "pool_w": normal(next(keys), (H, H)),
        "pool_b": jnp.zeros((H,), jnp.float32),
        "fc_w": normal(next(keys), (H, C)),
        "fc_b": jnp.zeros((C,), jnp.float32),
        "layers": [],
    }
    for _ in range(L):
        params["layers"].append({
            "wq": normal(next(keys), (H, H)), "bq": jnp.zeros((H,), jnp.float32),
            "wk": normal(next(keys), (H, H)), "bk": jnp.zeros((H,), jnp.float32),
            "wv": normal(next(keys), (H, H)), "bv": jnp.zeros((H,), jnp.float32),
            "wo": normal(next(keys), (H, H)), "bo": jnp.zeros((H,), jnp.float32),
            "ln1_g": jnp.ones((H,), jnp.float32), "ln1_b": jnp.zeros((H,), jnp.float32),
            "wi": normal(next(keys), (H, I)), "bi": jnp.zeros((I,), jnp.float32),
            "wf": normal(next(keys), (I, H)), "bf": jnp.zeros((H,), jnp.float32),
            "ln2_g": jnp.ones((H,), jnp.float32), "ln2_b": jnp.zeros((H,), jnp.float32),
        })
    return params


def prepare_params(params, cfg):
    """One-time, outside-jit weight prep for inference:
      * fused QKV weight/bias (bf16, with 1/sqrt(dh) folded into the q block),
      * all encoder / pooler weights pre-cast to bf16,
      * classifier head pre-padded to a lane-dense 128-wide output.
    The hot path then only streams ready-to-use bf16 weights from HBM."""
    H, nh, C = cfg["hidden"], cfg["heads"], cfg["classes"]
    dh = H // nh
    bf16 = jnp.bfloat16
    scale = 1.0 / float(dh) ** 0.5
    npad = max(128, ((C + 127) // 128) * 128)

    fc_w_pad = jnp.zeros((H, npad), jnp.float32).at[:, :C].set(params["fc_w"]).astype(bf16)
    fc_b_pad = jnp.zeros((npad,), jnp.float32).at[:C].set(params["fc_b"])

    prepped = {
        "word_emb": params["word_emb"],
        "pos_emb": params["pos_emb"],
        "type_emb": params["type_emb"],
        "emb_ln_g": params["emb_ln_g"], "emb_ln_b": params["emb_ln_b"],
        "pool_w": params["pool_w"].astype(bf16), "pool_b": params["pool_b"],
        "fc_w_pad": fc_w_pad, "fc_b_pad": fc_b_pad,
        "npad": npad,
        "layers": [],
    }
    for l in params["layers"]:
        prepped["layers"].append({
            # scale folded into q projection -> no S x S score multiply in-kernel
            "w_qkv": jnp.concatenate(
                [l["wq"] * scale, l["wk"], l["wv"]], axis=1).astype(bf16),
            "b_qkv": jnp.concatenate(
                [l["bq"] * scale, l["bk"], l["bv"]]).astype(jnp.float32),
            "wo": l["wo"].astype(bf16), "bo": l["bo"],
            "ln1_g": l["ln1_g"], "ln1_b": l["ln1_b"],
            "wi": l["wi"].astype(bf16), "bi": l["bi"],
            "wf": l["wf"].astype(bf16), "bf": l["bf"],
            "ln2_g": l["ln2_g"], "ln2_b": l["ln2_b"],
        })
    return prepped


def bert_classifier_forward(prepped, input_ids, token_type_ids, attention_mask, cfg):
    B, S = input_ids.shape
    H, nh, C = cfg["hidden"], cfg["heads"], cfg["classes"]
    bf16 = jnp.bfloat16

    # --- embeddings (gathers are XLA glue; layernorm is a Pallas kernel) ---
    emb = (prepped["word_emb"][input_ids]
           + prepped["pos_emb"][jnp.arange(S)][None, :, :]
           + prepped["type_emb"][token_type_ids]).astype(jnp.float32)
    x = pallas_layernorm(emb.reshape(B * S, H),
                         prepped["emb_ln_g"], prepped["emb_ln_b"],
                         out_dtype=bf16)                               # bf16 stream

    # additive attention mask [B, 1, S] (broadcast over query rows in-kernel)
    ext = ((1.0 - attention_mask.astype(jnp.float32)) * -10000.0)[:, None, :]

    for layer in prepped["layers"]:
        # fused QKV projection: one [H, 3H] bf16 matmul (pre-fused at prep time)
        qkv = pallas_linear(x, layer["w_qkv"], layer["b_qkv"])         # [B*S, 3H]

        # attention reads q/k/v straight from qkv; no XLA transposes
        ctx = pallas_attention_fused(qkv, ext, B=B, S=S, H=H, nh=nh)   # [B*S, H]

        # attention output projection with fused bias + residual + LayerNorm
        x = pallas_linear_ln(ctx, layer["wo"], layer["bo"], residual=x,
                             gamma=layer["ln1_g"], beta=layer["ln1_b"],
                             out_dtype=bf16)

        # FFN: intermediate (gelu) then output projection fused with LN
        inter = pallas_linear(x, layer["wi"], layer["bi"], activation="gelu")
        x = pallas_linear_ln(inter, layer["wf"], layer["bf"], residual=x,
                             gamma=layer["ln2_g"], beta=layer["ln2_b"],
                             out_dtype=bf16)

    # --- pooler (CLS token -> dense + tanh), then classification head ---
    cls = x.reshape(B, S, H)[:, 0, :]
    pooled = pallas_linear(cls, prepped["pool_w"], prepped["pool_b"],
                           activation="tanh")
    logits = pallas_linear(pooled, prepped["fc_w_pad"], prepped["fc_b_pad"],
                           out_dtype=jnp.float32)[:, :C]
    return logits


# ----------------------------------------------------------------------------
# main
# ----------------------------------------------------------------------------

if __name__ == "__main__":
    cfg = dict(vocab=50, max_pos=32, type_vocab=2, hidden=32, heads=2,
               intermediate=64, layers=2, classes=4)
    B, S = 2, 8

    key = jax.random.PRNGKey(0)
    k_param, k_ids, k_types = jax.random.split(key, 3)

    params = init_params(k_param, cfg)
    prepped = prepare_params(params, cfg)          # one-time weight prep, outside jit

    input_ids = jax.random.randint(k_ids, (B, S), 0, cfg["vocab"], dtype=jnp.int32)
    token_type_ids = jax.random.randint(k_types, (B, S), 0, cfg["type_vocab"],
                                        dtype=jnp.int32)
    # last two positions of the second example are padding
    attention_mask = jnp.ones((B, S), jnp.int32).at[1, -2:].set(0)

    fwd = jax.jit(lambda p, ids, tt, am: bert_classifier_forward(p, ids, tt, am, cfg))
    logits = fwd(prepped, input_ids, token_type_ids, attention_mask)
    jax.block_until_ready(logits)

    assert logits.shape == (B, cfg["classes"]) and logits.dtype == jnp.float32
    print("KERNEL_OK")
</pallas_src>

<mosaic_0001>
module attributes {stable_mosaic.version = 11 : i64} {
  func.func @kernel(%arg0: i32, %arg1: i32, %arg2: i32, %arg3: memref<16x32xbf16, #tpu.memory_space<vmem>>, %arg4: memref<32x96xbf16, #tpu.memory_space<vmem>>, %arg5: memref<1x96xf32, #tpu.memory_space<vmem>>, %arg6: memref<16x96xbf16, #tpu.memory_space<vmem>>, %arg7: memref<16x96xf32, #tpu.memory_space<vmem>>) attributes {dimension_semantics = [#tpu.dimension_semantics<parallel>, #tpu.dimension_semantics<parallel>, #tpu.dimension_semantics<arbitrary>], iteration_bounds = array<i64: 1, 1, 1>, scalar_prefetch = 0 : i64, scratch_operands = 1 : i64, tpu.core_type = #tpu.core_type<tc>, window_params = [{transform_indices = @transform_0, window_bounds = array<i64: 16, 32>}, {transform_indices = @transform_1, window_bounds = array<i64: 32, 96>}, {transform_indices = @transform_2, window_bounds = array<i64: 1, 96>}, {transform_indices = @transform_3, window_bounds = array<i64: 16, 96>}]} {
    %c0_i32 = arith.constant 0 : i32
    %0 = arith.cmpi eq, %arg2, %c0_i32 : i32
    %1 = arith.extui %0 : i1 to i32
    %c0_i32_0 = arith.constant 0 : i32
    %2 = arith.cmpi ne, %1, %c0_i32_0 : i32
    scf.if %2 {
      %cst_10 = arith.constant 0.000000e+00 : f32
      %12 = vector.broadcast %cst_10 : f32 to vector<16x96xf32>
      %c0_11 = arith.constant 0 : index
      %c0_12 = arith.constant 0 : index
      %13 = vector.load %arg7[%c0_11, %c0_12] : memref<16x96xf32, #tpu.memory_space<vmem>>, vector<16x96xf32>
      tpu.vector_store %arg7[%c0_11, %c0_12], %12 {strides = array<i32>} : memref<16x96xf32, #tpu.memory_space<vmem>>, vector<16x96xf32>,
    } else {
    }
    %c0 = arith.constant 0 : index
    %c0_1 = arith.constant 0 : index
    %3 = vector.load %arg7[%c0, %c0_1] : memref<16x96xf32, #tpu.memory_space<vmem>>, vector<16x96xf32>
    %c0_2 = arith.constant 0 : index
    %c0_3 = arith.constant 0 : index
    %4 = vector.load %arg3[%c0_2, %c0_3] : memref<16x32xbf16, #tpu.memory_space<vmem>>, vector<16x32xbf16>
    %c0_4 = arith.constant 0 : index
    %c0_5 = arith.constant 0 : index
    %5 = vector.load %arg4[%c0_4, %c0_5] : memref<32x96xbf16, #tpu.memory_space<vmem>>, vector<32x96xbf16>
    %cst = arith.constant dense<0.000000e+00> : vector<16x96xf32>
    %6 = tpu.matmul %4, %5, %cst {dimension_numbers = #tpu.dot_dimension_numbers<[1], [0], [0], [1], [0, 0, 1, 1], [], []>} : vector<16x32xbf16>, vector<32x96xbf16>, vector<16x96xf32> -> vector<16x96xf32>
    %7 = arith.addf %3, %6 : vector<16x96xf32>
    %c0_6 = arith.constant 0 : index
    %c0_7 = arith.constant 0 : index
    %8 = vector.load %arg7[%c0_6, %c0_7] : memref<16x96xf32, #tpu.memory_space<vmem>>, vector<16x96xf32>
    tpu.vector_store %arg7[%c0_6, %c0_7], %7 {strides = array<i32>} : memref<16x96xf32, #tpu.memory_space<vmem>>, vector<16x96xf32>,
    %c0_i32_8 = arith.constant 0 : i32
    %9 = arith.cmpi eq, %arg2, %c0_i32_8 : i32
    %10 = arith.extui %9 : i1 to i32
    %c0_i32_9 = arith.constant 0 : i32
    %11 = arith.cmpi ne, %10, %c0_i32_9 : i32
    scf.if %11 {
      %c0_10 = arith.constant 0 : index
      %c0_11 = arith.constant 0 : index
      %12 = vector.load %arg7[%c0_10, %c0_11] : memref<16x96xf32, #tpu.memory_space<vmem>>, vector<16x96xf32>
      %c0_12 = arith.constant 0 : index
      %c0_13 = arith.constant 0 : index
      %13 = vector.load %arg5[%c0_12, %c0_13] : memref<1x96xf32, #tpu.memory_space<vmem>>, vector<1x96xf32>
      %14 = vector.broadcast %13 : vector<1x96xf32> to vector<16x96xf32>
      %15 = arith.addf %12, %14 : vector<16x96xf32>
      %16 = arith.truncf %15 : vector<16x96xf32> to vector<16x96xbf16>
      %c0_14 = arith.constant 0 : index
      %c0_15 = arith.constant 0 : index
      %17 = vector.load %arg6[%c0_14, %c0_15] : memref<16x96xbf16, #tpu.memory_space<vmem>>, vector<16x96xbf16>
      tpu.vector_store %arg6[%c0_14, %c0_15], %16 {strides = array<i32>} : memref<16x96xbf16, #tpu.memory_space<vmem>>, vector<16x96xbf16>,
    } else {
    }
    return
  }
  func.func @transform_0(%arg0: i32, %arg1: i32, %arg2: i32) -> (i32, i32) {
    %c0_i32 = arith.constant 0 : i32
    return %arg0, %arg2 : i32, i32
  }
  func.func @transform_1(%arg0: i32, %arg1: i32, %arg2: i32) -> (i32, i32) {
    %c0_i32 = arith.constant 0 : i32
    return %arg2, %arg1 : i32, i32
  }
  func.func @transform_2(%arg0: i32, %arg1: i32, %arg2: i32) -> (i32, i32) {
    %c0_i32 = arith.constant 0 : i32
    %c0_i32_0 = arith.constant 0 : i32
    return %c0_i32, %arg1 : i32, i32
  }
  func.func @transform_3(%arg0: i32, %arg1: i32, %arg2: i32) -> (i32, i32) {
    %c0_i32 = arith.constant 0 : i32
    return %arg0, %arg1 : i32, i32
  }
}

module attributes {stable_mosaic.version = 11 : i64} {
  func.func @kernel(%arg0: i32, %arg1: i32, %arg2: memref<16x32xbf16, #tpu.memory_space<vmem>>, %arg3: memref<32x32xbf16, #tpu.memory_space<vmem>>, %arg4: memref<1x32xf32, #tpu.memory_space<vmem>>, %arg5: memref<16x32xbf16, #tpu.memory_space<vmem>>, %arg6: memref<1x32xf32, #tpu.memory_space<vmem>>, %arg7: memref<1x32xf32, #tpu.memory_space<vmem>>, %arg8: memref<16x32xbf16, #tpu.memory_space<vmem>>, %arg9: memref<16x32xf32, #tpu.memory_space<vmem>>) attributes {dimension_semantics = [#tpu.dimension_semantics<parallel>, #tpu.dimension_semantics<arbitrary>], iteration_bounds = array<i64: 1, 1>, scalar_prefetch = 0 : i64, scratch_operands = 1 : i64, tpu.core_type = #tpu.core_type<tc>, window_params = [{transform_indices = @transform_0, window_bounds = array<i64: 16, 32>}, {transform_indices = @transform_1, window_bounds = array<i64: 32, 32>}, {pipeline_mode = #tpu.pipeline_mode<synchronous>, transform_indices = @transform_2, window_bounds = array<i64: 1, 32>}, {transform_indices = @transform_3, window_bounds = array<i64: 16, 32>}, {pipeline_mode = #tpu.pipeline_mode<synchronous>, transform_indices = @transform_4, window_bounds = array<i64: 1, 32>}, {pipeline_mode = #tpu.pipeline_mode<synchronous>, transform_indices = @transform_5, window_bounds = array<i64: 1, 32>}, {transform_indices = @transform_6, window_bounds = array<i64: 16, 32>}]} {
    %c0_i32 = arith.constant 0 : i32
    %0 = arith.cmpi eq, %arg1, %c0_i32 : i32
    %1 = arith.extui %0 : i1 to i32
    %c0_i32_0 = arith.constant 0 : i32
    %2 = arith.cmpi ne, %1, %c0_i32_0 : i32
    scf.if %2 {
      %cst_10 = arith.constant 0.000000e+00 : f32
      %12 = vector.broadcast %cst_10 : f32 to vector<16x32xf32>
      %c0_11 = arith.constant 0 : index
      %c0_12 = arith.constant 0 : index
      %13 = vector.load %arg9[%c0_11, %c0_12] : memref<16x32xf32, #tpu.memory_space<vmem>>, vector<16x32xf32>
      tpu.vector_store %arg9[%c0_11, %c0_12], %12 {strides = array<i32>} : memref<16x32xf32, #tpu.memory_space<vmem>>, vector<16x32xf32>,
    } else {
    }
    %c0 = arith.constant 0 : index
    %c0_1 = arith.constant 0 : index
    %3 = vector.load %arg9[%c0, %c0_1] : memref<16x32xf32, #tpu.memory_space<vmem>>, vector<16x32xf32>
    %c0_2 = arith.constant 0 : index
    %c0_3 = arith.constant 0 : index
    %4 = vector.load %arg2[%c0_2, %c0_3] : memref<16x32xbf16, #tpu.memory_space<vmem>>, vector<16x32xbf16>
    %c0_4 = arith.constant 0 : index
    %c0_5 = arith.constant 0 : index
    %5 = vector.load %arg3[%c0_4, %c0_5] : memref<32x32xbf16, #tpu.memory_space<vmem>>, vector<32x32xbf16>
    %cst = arith.constant dense<0.000000e+00> : vector<16x32xf32>
    %6 = tpu.matmul %4, %5, %cst {dimension_numbers = #tpu.dot_dimension_numbers<[1], [0], [0], [1], [0, 0, 1, 1], [], []>} : vector<16x32xbf16>, vector<32x32xbf16>, vector<16x32xf32> -> vector<16x32xf32>
    %7 = arith.addf %3, %6 : vector<16x32xf32>
    %c0_6 = arith.constant 0 : index
    %c0_7 = arith.constant 0 : index
    %8 = vector.load %arg9[%c0_6, %c0_7] : memref<16x32xf32, #tpu.memory_space<vmem>>, vector<16x32xf32>
    tpu.vector_store %arg9[%c0_6, %c0_7], %7 {strides = array<i32>} : memref<16x32xf32, #tpu.memory_space<vmem>>, vector<16x32xf32>,
    %c0_i32_8 = arith.constant 0 : i32
    %9 = arith.cmpi eq, %arg1, %c0_i32_8 : i32
    %10 = arith.extui %9 : i1 to i32
    %c0_i32_9 = arith.constant 0 : i32
    %11 = arith.cmpi ne, %10, %c0_i32_9 : i32
    scf.if %11 {
      %c0_10 = arith.constant 0 : index
      %c0_11 = arith.constant 0 : index
      %12 = vector.load %arg9[%c0_10, %c0_11] : memref<16x32xf32, #tpu.memory_space<vmem>>, vector<16x32xf32>
      %c0_12 = arith.constant 0 : index
      %c0_13 = arith.constant 0 : index
      %13 = vector.load %arg4[%c0_12, %c0_13] : memref<1x32xf32, #tpu.memory_space<vmem>>, vector<1x32xf32>
      %14 = vector.broadcast %13 : vector<1x32xf32> to vector<16x32xf32>
      %15 = arith.addf %12, %14 : vector<16x32xf32>
      %c0_14 = arith.constant 0 : index
      %c0_15 = arith.constant 0 : index
      %16 = vector.load %arg5[%c0_14, %c0_15] : memref<16x32xbf16, #tpu.memory_space<vmem>>, vector<16x32xbf16>
      %17 = arith.extf %16 : vector<16x32xbf16> to vector<16x32xf32>
      %18 = arith.addf %15, %17 : vector<16x32xf32>
      %c0_16 = arith.constant 0 : index
      %c0_17 = arith.constant 0 : index
      %19 = vector.load %arg6[%c0_16, %c0_17] : memref<1x32xf32, #tpu.memory_space<vmem>>, vector<1x32xf32>
      %c0_18 = arith.constant 0 : index
      %c0_19 = arith.constant 0 : index
      %20 = vector.load %arg7[%c0_18, %c0_19] : memref<1x32xf32, #tpu.memory_space<vmem>>, vector<1x32xf32>
      %cst_20 = arith.constant dense<0.000000e+00> : vector<16xf32>
      %21 = vector.multi_reduction <add>, %18, %cst_20 [1] : vector<16x32xf32> to vector<16xf32>
      %22 = vector.shape_cast %21 : vector<16xf32> to vector<16x1xf32>
      %cst_21 = arith.constant 3.200000e+01 : f32
      %23 = vector.broadcast %cst_21 : f32 to vector<16x1xf32>
      %24 = arith.divf %22, %23 : vector<16x1xf32>
      %25 = vector.broadcast %24 : vector<16x1xf32> to vector<16x32xf32>
      %26 = arith.subf %18, %25 : vector<16x32xf32>
      %27 = arith.mulf %26, %26 : vector<16x32xf32>
      %cst_22 = arith.constant dense<0.000000e+00> : vector<16xf32>
      %28 = vector.multi_reduction <add>, %27, %cst_22 [1] : vector<16x32xf32> to vector<16xf32>
      %29 = vector.shape_cast %28 : vector<16xf32> to vector<16x1xf32>
      %cst_23 = arith.constant 3.200000e+01 : f32
      %30 = vector.broadcast %cst_23 : f32 to vector<16x1xf32>
      %31 = arith.divf %29, %30 : vector<16x1xf32>
      %32 = vector.broadcast %24 : vector<16x1xf32> to vector<16x32xf32>
      %33 = arith.subf %18, %32 : vector<16x32xf32>
      %cst_24 = arith.constant 9.99999996E-13 : f32
      %34 = vector.broadcast %cst_24 : f32 to vector<16x1xf32>
      %35 = arith.addf %31, %34 : vector<16x1xf32>
      %36 = math.rsqrt %35 : vector<16x1xf32>
      %37 = vector.broadcast %36 : vector<16x1xf32> to vector<16x32xf32>
      %38 = arith.mulf %33, %37 : vector<16x32xf32>
      %39 = vector.broadcast %19 : vector<1x32xf32> to vector<16x32xf32>
      %40 = arith.mulf %38, %39 : vector<16x32xf32>
      %41 = vector.broadcast %20 : vector<1x32xf32> to vector<16x32xf32>
      %42 = arith.addf %40, %41 : vector<16x32xf32>
      %43 = arith.truncf %42 : vector<16x32xf32> to vector<16x32xbf16>
      %c0_25 = arith.constant 0 : index
      %c0_26 = arith.constant 0 : index
      %44 = vector.load %arg8[%c0_25, %c0_26] : memref<16x32xbf16, #tpu.memory_space<vmem>>, vector<16x32xbf16>
      tpu.vector_store %arg8[%c0_25, %c0_26], %43 {strides = array<i32>} : memref<16x32xbf16, #tpu.memory_space<vmem>>, vector<16x32xbf16>,
    } else {
    }
    return
  }
  func.func @transform_0(%arg0: i32, %arg1: i32) -> (i32, i32) {
    %c0_i32 = arith.constant 0 : i32
    return %arg0, %arg1 : i32, i32
  }
  func.func @transform_1(%arg0: i32, %arg1: i32) -> (i32, i32) {
    %c0_i32 = arith.constant 0 : i32
    %c0_i32_0 = arith.constant 0 : i32
    return %arg1, %c0_i32 : i32, i32
  }
  func.func @transform_2(%arg0: i32, %arg1: i32) -> (i32, i32) {
    %c0_i32 = arith.constant 0 : i32
    %c0_i32_0 = arith.constant 0 : i32
    %c0_i32_1 = arith.constant 0 : i32
    return %c0_i32, %c0_i32_0 : i32, i32
  }
  func.func @transform_3(%arg0: i32, %arg1: i32) -> (i32, i32) {
    %c0_i32 = arith.constant 0 : i32
    %c0_i32_0 = arith.constant 0 : i32
    return %arg0, %c0_i32 : i32, i32
  }
  func.func @transform_4(%arg0: i32, %arg1: i32) -> (i32, i32) {
    %c0_i32 = arith.constant 0 : i32
    %c0_i32_0 = arith.constant 0 : i32
    %c0_i32_1 = arith.constant 0 : i32
    return %c0_i32, %c0_i32_0 : i32, i32
  }
  func.func @transform_5(%arg0: i32, %arg1: i32) -> (i32, i32) {
    %c0_i32 = arith.constant 0 : i32
    %c0_i32_0 = arith.constant 0 : i32
    %c0_i32_1 = arith.constant 0 : i32
    return %c0_i32, %c0_i32_0 : i32, i32
  }
  func.func @transform_6(%arg0: i32, %arg1: i32) -> (i32, i32) {
    %c0_i32 = arith.constant 0 : i32
    %c0_i32_0 = arith.constant 0 : i32
    return %arg0, %c0_i32 : i32, i32
  }
}

module attributes {stable_mosaic.version = 11 : i64} {
  func.func @kernel(%arg0: i32, %arg1: memref<16x32xf32, #tpu.memory_space<vmem>>, %arg2: memref<1x32xf32, #tpu.memory_space<vmem>>, %arg3: memref<1x32xf32, #tpu.memory_space<vmem>>, %arg4: memref<16x32xbf16, #tpu.memory_space<vmem>>) attributes {dimension_semantics = [#tpu.dimension_semantics<parallel>], iteration_bounds = array<i64: 1>, scalar_prefetch = 0 : i64, scratch_operands = 0 : i64, tpu.core_type = #tpu.core_type<tc>, window_params = [{transform_indices = @transform_0, window_bounds = array<i64: 16, 32>}, {pipeline_mode = #tpu.pipeline_mode<synchronous>, transform_indices = @transform_1, window_bounds = array<i64: 1, 32>}, {pipeline_mode = #tpu.pipeline_mode<synchronous>, transform_indices = @transform_2, window_bounds = array<i64: 1, 32>}, {transform_indices = @transform_3, window_bounds = array<i64: 16, 32>}]} {
    %c0 = arith.constant 0 : index
    %c0_0 = arith.constant 0 : index
    %0 = vector.load %arg1[%c0, %c0_0] : memref<16x32xf32, #tpu.memory_space<vmem>>, vector<16x32xf32>
    %c0_1 = arith.constant 0 : index
    %c0_2 = arith.constant 0 : index
    %1 = vector.load %arg2[%c0_1, %c0_2] : memref<1x32xf32, #tpu.memory_space<vmem>>, vector<1x32xf32>
    %c0_3 = arith.constant 0 : index
    %c0_4 = arith.constant 0 : index
    %2 = vector.load %arg3[%c0_3, %c0_4] : memref<1x32xf32, #tpu.memory_space<vmem>>, vector<1x32xf32>
    %cst = arith.constant dense<0.000000e+00> : vector<16xf32>
    %3 = vector.multi_reduction <add>, %0, %cst [1] : vector<16x32xf32> to vector<16xf32>
    %4 = vector.shape_cast %3 : vector<16xf32> to vector<16x1xf32>
    %cst_5 = arith.constant 3.200000e+01 : f32
    %5 = vector.broadcast %cst_5 : f32 to vector<16x1xf32>
    %6 = arith.divf %4, %5 : vector<16x1xf32>
    %7 = vector.broadcast %6 : vector<16x1xf32> to vector<16x32xf32>
    %8 = arith.subf %0, %7 : vector<16x32xf32>
    %9 = arith.mulf %8, %8 : vector<16x32xf32>
    %cst_6 = arith.constant dense<0.000000e+00> : vector<16xf32>
    %10 = vector.multi_reduction <add>, %9, %cst_6 [1] : vector<16x32xf32> to vector<16xf32>
    %11 = vector.shape_cast %10 : vector<16xf32> to vector<16x1xf32>
    %cst_7 = arith.constant 3.200000e+01 : f32
    %12 = vector.broadcast %cst_7 : f32 to vector<16x1xf32>
    %13 = arith.divf %11, %12 : vector<16x1xf32>
    %14 = vector.broadcast %6 : vector<16x1xf32> to vector<16x32xf32>
    %15 = arith.subf %0, %14 : vector<16x32xf32>
    %cst_8 = arith.constant 9.99999996E-13 : f32
    %16 = vector.broadcast %cst_8 : f32 to vector<16x1xf32>
    %17 = arith.addf %13, %16 : vector<16x1xf32>
    %18 = math.rsqrt %17 : vector<16x1xf32>
    %19 = vector.broadcast %18 : vector<16x1xf32> to vector<16x32xf32>
    %20 = arith.mulf %15, %19 : vector<16x32xf32>
    %21 = vector.broadcast %1 : vector<1x32xf32> to vector<16x32xf32>
    %22 = arith.mulf %20, %21 : vector<16x32xf32>
    %23 = vector.broadcast %2 : vector<1x32xf32> to vector<16x32xf32>
    %24 = arith.addf %22, %23 : vector<16x32xf32>
    %25 = arith.truncf %24 : vector<16x32xf32> to vector<16x32xbf16>
    %c0_9 = arith.constant 0 : index
    %c0_10 = arith.constant 0 : index
    %26 = vector.load %arg4[%c0_9, %c0_10] : memref<16x32xbf16, #tpu.memory_space<vmem>>, vector<16x32xbf16>
    tpu.vector_store %arg4[%c0_9, %c0_10], %25 {strides = array<i32>} : memref<16x32xbf16, #tpu.memory_space<vmem>>, vector<16x32xbf16>,
    return
  }
  func.func @transform_0(%arg0: i32) -> (i32, i32) {
    %c0_i32 = arith.constant 0 : i32
    %c0_i32_0 = arith.constant 0 : i32
    return %arg0, %c0_i32 : i32, i32
  }
  func.func @transform_1(%arg0: i32) -> (i32, i32) {
    %c0_i32 = arith.constant 0 : i32
    %c0_i32_0 = arith.constant 0 : i32
    %c0_i32_1 = arith.constant 0 : i32
    return %c0_i32, %c0_i32_0 : i32, i32
  }
  func.func @transform_2(%arg0: i32) -> (i32, i32) {
    %c0_i32 = arith.constant 0 : i32
    %c0_i32_0 = arith.constant 0 : i32
    %c0_i32_1 = arith.constant 0 : i32
    return %c0_i32, %c0_i32_0 : i32, i32
  }
  func.func @transform_3(%arg0: i32) -> (i32, i32) {
    %c0_i32 = arith.constant 0 : i32
    %c0_i32_0 = arith.constant 0 : i32
    return %arg0, %c0_i32 : i32, i32
  }
}

module attributes {stable_mosaic.version = 11 : i64} {
  func.func @kernel(%arg0: i32, %arg1: memref<8x96xbf16, #tpu.memory_space<vmem>>, %arg2: memref<1x1x8xf32, #tpu.memory_space<vmem>>, %arg3: memref<8x32xbf16, #tpu.memory_space<vmem>>) attributes {dimension_semantics = [#tpu.dimension_semantics<parallel>], iteration_bounds = array<i64: 2>, scalar_prefetch = 0 : i64, scratch_operands = 0 : i64, tpu.core_type = #tpu.core_type<tc>, window_params = [{transform_indices = @transform_0, window_bounds = array<i64: 8, 96>}, {transform_indices = @transform_1, window_bounds = array<i64: 1, 1, 8>}, {transform_indices = @transform_2, window_bounds = array<i64: 8, 32>}]} {
    %c0 = arith.constant 0 : index
    %c0_0 = arith.constant 0 : index
    %0 = vector.load %arg1[%c0, %c0_0] : memref<8x96xbf16, #tpu.memory_space<vmem>>, vector<8x96xbf16>
    %c0_1 = arith.constant 0 : index
    %c0_2 = arith.constant 0 : index
    %c0_3 = arith.constant 0 : index
    %1 = vector.load %arg2[%c0_1, %c0_2, %c0_3] : memref<1x1x8xf32, #tpu.memory_space<vmem>>, vector<1x1x8xf32>
    %2 = vector.shape_cast %1 : vector<1x1x8xf32> to vector<1x8xf32>
    %3 = vector.extract_strided_slice %0 {offsets = [0, 0], sizes = [8, 16], strides = [1, 1]} : vector<8x96xbf16> to vector<8x16xbf16>
    %4 = vector.extract_strided_slice %0 {offsets = [0, 32], sizes = [8, 16], strides = [1, 1]} : vector<8x96xbf16> to vector<8x16xbf16>
    %5 = vector.extract_strided_slice %0 {offsets = [0, 64], sizes = [8, 16], strides = [1, 1]} : vector<8x96xbf16> to vector<8x16xbf16>
    "tpu.trace_start"() <{level = 10 : i32, message = "qd,kd->qk"}> : () -> ()
    %cst = arith.constant dense<0.000000e+00> : vector<8x8xf32>
    %6 = tpu.matmul %3, %4, %cst {dimension_numbers = #tpu.dot_dimension_numbers<[1], [1], [0], [0], [0, 0, 1, 0], [], []>} : vector<8x16xbf16>, vector<8x16xbf16>, vector<8x8xf32> -> vector<8x8xf32>
    "tpu.trace_stop"() : () -> ()
    %7 = vector.broadcast %2 : vector<1x8xf32> to vector<8x8xf32>
    %8 = arith.addf %6, %7 : vector<8x8xf32>
    %cst_4 = arith.constant dense<0xFF800000> : vector<8xf32>
    %9 = vector.multi_reduction <maximumf>, %8, %cst_4 [1] : vector<8x8xf32> to vector<8xf32>
    %10 = vector.shape_cast %9 : vector<8xf32> to vector<8x1xf32>
    %11 = vector.broadcast %10 : vector<8x1xf32> to vector<8x8xf32>
    %12 = arith.subf %8, %11 : vector<8x8xf32>
    %13 = math.exp %12 : vector<8x8xf32>
    %cst_5 = arith.constant dense<0.000000e+00> : vector<8xf32>
    %14 = vector.multi_reduction <add>, %13, %cst_5 [1] : vector<8x8xf32> to vector<8xf32>
    %15 = vector.shape_cast %14 : vector<8xf32> to vector<8x1xf32>
    %16 = tpu.reciprocal %15 {approx = true} : vector<8x1xf32> -> vector<8x1xf32>
    %17 = vector.broadcast %16 : vector<8x1xf32> to vector<8x8xf32>
    %18 = arith.mulf %13, %17 : vector<8x8xf32>
    %19 = arith.truncf %18 : vector<8x8xf32> to vector<8x8xbf16>
    %cst_6 = arith.constant dense<0.000000e+00> : vector<8x16xf32>
    %20 = tpu.matmul %19, %5, %cst_6 {dimension_numbers = #tpu.dot_dimension_numbers<[1], [0], [0], [1], [0, 0, 1, 1], [], []>} : vector<8x8xbf16>, vector<8x16xbf16>, vector<8x16xf32> -> vector<8x16xf32>
    %21 = arith.truncf %20 : vector<8x16xf32> to vector<8x16xbf16>
    %22 = vector.extract_strided_slice %0 {offsets = [0, 16], sizes = [8, 16], strides = [1, 1]} : vector<8x96xbf16> to vector<8x16xbf16>
    %23 = vector.extract_strided_slice %0 {offsets = [0, 48], sizes = [8, 16], strides = [1, 1]} : vector<8x96xbf16> to vector<8x16xbf16>
    %24 = vector.extract_strided_slice %0 {offsets = [0, 80], sizes = [8, 16], strides = [1, 1]} : vector<8x96xbf16> to vector<8x16xbf16>
    "tpu.trace_start"() <{level = 10 : i32, message = "qd,kd->qk"}> : () -> ()
    %cst_7 = arith.constant dense<0.000000e+00> : vector<8x8xf32>
    %25 = tpu.matmul %22, %23, %cst_7 {dimension_numbers = #tpu.dot_dimension_numbers<[1], [1], [0], [0], [0, 0, 1, 0], [], []>} : vector<8x16xbf16>, vector<8x16xbf16>, vector<8x8xf32> -> vector<8x8xf32>
    "tpu.trace_stop"() : () -> ()
    %26 = vector.broadcast %2 : vector<1x8xf32> to vector<8x8xf32>
    %27 = arith.addf %25, %26 : vector<8x8xf32>
    %cst_8 = arith.constant dense<0xFF800000> : vector<8xf32>
    %28 = vector.multi_reduction <maximumf>, %27, %cst_8 [1] : vector<8x8xf32> to vector<8xf32>
    %29 = vector.shape_cast %28 : vector<8xf32> to vector<8x1xf32>
    %30 = vector.broadcast %29 : vector<8x1xf32> to vector<8x8xf32>
    %31 = arith.subf %27, %30 : vector<8x8xf32>
    %32 = math.exp %31 : vector<8x8xf32>
    %cst_9 = arith.constant dense<0.000000e+00> : vector<8xf32>
    %33 = vector.multi_reduction <add>, %32, %cst_9 [1] : vector<8x8xf32> to vector<8xf32>
    %34 = vector.shape_cast %33 : vector<8xf32> to vector<8x1xf32>
    %35 = tpu.reciprocal %34 {approx = true} : vector<8x1xf32> -> vector<8x1xf32>
    %36 = vector.broadcast %35 : vector<8x1xf32> to vector<8x8xf32>
    %37 = arith.mulf %32, %36 : vector<8x8xf32>
    %38 = arith.truncf %37 : vector<8x8xf32> to vector<8x8xbf16>
    %cst_10 = arith.constant dense<0.000000e+00> : vector<8x16xf32>
    %39 = tpu.matmul %38, %24, %cst_10 {dimension_numbers = #tpu.dot_dimension_numbers<[1], [0], [0], [1], [0, 0, 1, 1], [], []>} : vector<8x8xbf16>, vector<8x16xbf16>, vector<8x16xf32> -> vector<8x16xf32>
    %40 = arith.truncf %39 : vector<8x16xf32> to vector<8x16xbf16>
    %41 = tpu.concatenate %21, %40 in 1 : vector<8x16xbf16>, vector<8x16xbf16> -> vector<8x32xbf16>
    %c0_11 = arith.constant 0 : index
    %c0_12 = arith.constant 0 : index
    %42 = vector.load %arg3[%c0_11, %c0_12] : memref<8x32xbf16, #tpu.memory_space<vmem>>, vector<8x32xbf16>
    tpu.vector_store %arg3[%c0_11, %c0_12], %41 {strides = array<i32>} : memref<8x32xbf16, #tpu.memory_space<vmem>>, vector<8x32xbf16>,
    return
  }
  func.func @transform_0(%arg0: i32) -> (i32, i32) {
    %c0_i32 = arith.constant 0 : i32
    %c0_i32_0 = arith.constant 0 : i32
    return %arg0, %c0_i32 : i32, i32
  }
  func.func @transform_1(%arg0: i32) -> (i32, i32, i32) {
    %c0_i32 = arith.constant 0 : i32
    %c0_i32_0 = arith.constant 0 : i32
    %c0_i32_1 = arith.constant 0 : i32
    return %arg0, %c0_i32, %c0_i32_0 : i32, i32, i32
  }
  func.func @transform_2(%arg0: i32) -> (i32, i32) {
    %c0_i32 = arith.constant 0 : i32
    %c0_i32_0 = arith.constant 0 : i32
    return %arg0, %c0_i32 : i32, i32
  }
}

module attributes {stable_mosaic.version = 11 : i64} {
  func.func @kernel(%arg0: i32, %arg1: i32, %arg2: i32, %arg3: memref<16x32xbf16, #tpu.memory_space<vmem>>, %arg4: memref<32x64xbf16, #tpu.memory_space<vmem>>, %arg5: memref<1x64xf32, #tpu.memory_space<vmem>>, %arg6: memref<16x64xbf16, #tpu.memory_space<vmem>>, %arg7: memref<16x64xf32, #tpu.memory_space<vmem>>) attributes {dimension_semantics = [#tpu.dimension_semantics<parallel>, #tpu.dimension_semantics<parallel>, #tpu.dimension_semantics<arbitrary>], iteration_bounds = array<i64: 1, 1, 1>, scalar_prefetch = 0 : i64, scratch_operands = 1 : i64, tpu.core_type = #tpu.core_type<tc>, window_params = [{transform_indices = @transform_0, window_bounds = array<i64: 16, 32>}, {transform_indices = @transform_1, window_bounds = array<i64: 32, 64>}, {transform_indices = @transform_2, window_bounds = array<i64: 1, 64>}, {transform_indices = @transform_3, window_bounds = array<i64: 16, 64>}]} {
    %c0_i32 = arith.constant 0 : i32
    %0 = arith.cmpi eq, %arg2, %c0_i32 : i32
    %1 = arith.extui %0 : i1 to i32
    %c0_i32_0 = arith.constant 0 : i32
    %2 = arith.cmpi ne, %1, %c0_i32_0 : i32
    scf.if %2 {
      %cst_10 = arith.constant 0.000000e+00 : f32
      %12 = vector.broadcast %cst_10 : f32 to vector<16x64xf32>
      %c0_11 = arith.constant 0 : index
      %c0_12 = arith.constant 0 : index
      %13 = vector.load %arg7[%c0_11, %c0_12] : memref<16x64xf32, #tpu.memory_space<vmem>>, vector<16x64xf32>
      tpu.vector_store %arg7[%c0_11, %c0_12], %12 {strides = array<i32>} : memref<16x64xf32, #tpu.memory_space<vmem>>, vector<16x64xf32>,
    } else {
    }
    %c0 = arith.constant 0 : index
    %c0_1 = arith.constant 0 : index
    %3 = vector.load %arg7[%c0, %c0_1] : memref<16x64xf32, #tpu.memory_space<vmem>>, vector<16x64xf32>
    %c0_2 = arith.constant 0 : index
    %c0_3 = arith.constant 0 : index
    %4 = vector.load %arg3[%c0_2, %c0_3] : memref<16x32xbf16, #tpu.memory_space<vmem>>, vector<16x32xbf16>
    %c0_4 = arith.constant 0 : index
    %c0_5 = arith.constant 0 : index
    %5 = vector.load %arg4[%c0_4, %c0_5] : memref<32x64xbf16, #tpu.memory_space<vmem>>, vector<32x64xbf16>
    %cst = arith.constant dense<0.000000e+00> : vector<16x64xf32>
    %6 = tpu.matmul %4, %5, %cst {dimension_numbers = #tpu.dot_dimension_numbers<[1], [0], [0], [1], [0, 0, 1, 1], [], []>} : vector<16x32xbf16>, vector<32x64xbf16>, vector<16x64xf32> -> vector<16x64xf32>
    %7 = arith.addf %3, %6 : vector<16x64xf32>
    %c0_6 = arith.constant 0 : index
    %c0_7 = arith.constant 0 : index
    %8 = vector.load %arg7[%c0_6, %c0_7] : memref<16x64xf32, #tpu.memory_space<vmem>>, vector<16x64xf32>
    tpu.vector_store %arg7[%c0_6, %c0_7], %7 {strides = array<i32>} : memref<16x64xf32, #tpu.memory_space<vmem>>, vector<16x64xf32>,
    %c0_i32_8 = arith.constant 0 : i32
    %9 = arith.cmpi eq, %arg2, %c0_i32_8 : i32
    %10 = arith.extui %9 : i1 to i32
    %c0_i32_9 = arith.constant 0 : i32
    %11 = arith.cmpi ne, %10, %c0_i32_9 : i32
    scf.if %11 {
      %c0_10 = arith.constant 0 : index
      %c0_11 = arith.constant 0 : index
      %12 = vector.load %arg7[%c0_10, %c0_11] : memref<16x64xf32, #tpu.memory_space<vmem>>, vector<16x64xf32>
      %c0_12 = arith.constant 0 : index
      %c0_13 = arith.constant 0 : index
      %13 = vector.load %arg5[%c0_12, %c0_13] : memref<1x64xf32, #tpu.memory_space<vmem>>, vector<1x64xf32>
      %14 = vector.broadcast %13 : vector<1x64xf32> to vector<16x64xf32>
      %15 = arith.addf %12, %14 : vector<16x64xf32>
      %cst_14 = arith.constant 5.000000e-01 : f32
      %16 = vector.broadcast %cst_14 : f32 to vector<16x64xf32>
      %17 = arith.mulf %16, %15 : vector<16x64xf32>
      %cst_15 = arith.constant 4.471500e-02 : f32
      %18 = vector.broadcast %cst_15 : f32 to vector<16x64xf32>
      %19 = arith.mulf %18, %15 : vector<16x64xf32>
      %20 = arith.mulf %19, %15 : vector<16x64xf32>
      %21 = arith.mulf %20, %15 : vector<16x64xf32>
      %22 = arith.addf %15, %21 : vector<16x64xf32>
      %cst_16 = arith.constant 0.797884583 : f32
      %23 = vector.broadcast %cst_16 : f32 to vector<16x64xf32>
      %24 = arith.mulf %23, %22 : vector<16x64xf32>
      %25 = math.tanh %24 : vector<16x64xf32>
      %cst_17 = arith.constant 1.000000e+00 : f32
      %26 = vector.broadcast %cst_17 : f32 to vector<16x64xf32>
      %27 = arith.addf %26, %25 : vector<16x64xf32>
      %28 = arith.mulf %17, %27 : vector<16x64xf32>
      %29 = arith.truncf %28 : vector<16x64xf32> to vector<16x64xbf16>
      %c0_18 = arith.constant 0 : index
      %c0_19 = arith.constant 0 : index
      %30 = vector.load %arg6[%c0_18, %c0_19] : memref<16x64xbf16, #tpu.memory_space<vmem>>, vector<16x64xbf16>
      tpu.vector_store %arg6[%c0_18, %c0_19], %29 {strides = array<i32>} : memref<16x64xbf16, #tpu.memory_space<vmem>>, vector<16x64xbf16>,
    } else {
    }
    return
  }
  func.func @transform_0(%arg0: i32, %arg1: i32, %arg2: i32) -> (i32, i32) {
    %c0_i32 = arith.constant 0 : i32
    return %arg0, %arg2 : i32, i32
  }
  func.func @transform_1(%arg0: i32, %arg1: i32, %arg2: i32) -> (i32, i32) {
    %c0_i32 = arith.constant 0 : i32
    return %arg2, %arg1 : i32, i32
  }
  func.func @transform_2(%arg0: i32, %arg1: i32, %arg2: i32) -> (i32, i32) {
    %c0_i32 = arith.constant 0 : i32
    %c0_i32_0 = arith.constant 0 : i32
    return %c0_i32, %arg1 : i32, i32
  }
  func.func @transform_3(%arg0: i32, %arg1: i32, %arg2: i32) -> (i32, i32) {
    %c0_i32 = arith.constant 0 : i32
    return %arg0, %arg1 : i32, i32
  }
}

module attributes {stable_mosaic.version = 11 : i64} {
  func.func @kernel(%arg0: i32, %arg1: i32, %arg2: memref<16x64xbf16, #tpu.memory_space<vmem>>, %arg3: memref<64x32xbf16, #tpu.memory_space<vmem>>, %arg4: memref<1x32xf32, #tpu.memory_space<vmem>>, %arg5: memref<16x32xbf16, #tpu.memory_space<vmem>>, %arg6: memref<1x32xf32, #tpu.memory_space<vmem>>, %arg7: memref<1x32xf32, #tpu.memory_space<vmem>>, %arg8: memref<16x32xbf16, #tpu.memory_space<vmem>>, %arg9: memref<16x32xf32, #tpu.memory_space<vmem>>) attributes {dimension_semantics = [#tpu.dimension_semantics<parallel>, #tpu.dimension_semantics<arbitrary>], iteration_bounds = array<i64: 1, 1>, scalar_prefetch = 0 : i64, scratch_operands = 1 : i64, tpu.core_type = #tpu.core_type<tc>, window_params = [{transform_indices = @transform_0, window_bounds = array<i64: 16, 64>}, {transform_indices = @transform_1, window_bounds = array<i64: 64, 32>}, {pipeline_mode = #tpu.pipeline_mode<synchronous>, transform_indices = @transform_2, window_bounds = array<i64: 1, 32>}, {transform_indices = @transform_3, window_bounds = array<i64: 16, 32>}, {pipeline_mode = #tpu.pipeline_mode<synchronous>, transform_indices = @transform_4, window_bounds = array<i64: 1, 32>}, {pipeline_mode = #tpu.pipeline_mode<synchronous>, transform_indices = @transform_5, window_bounds = array<i64: 1, 32>}, {transform_indices = @transform_6, window_bounds = array<i64: 16, 32>}]} {
    %c0_i32 = arith.constant 0 : i32
    %0 = arith.cmpi eq, %arg1, %c0_i32 : i32
    %1 = arith.extui %0 : i1 to i32
    %c0_i32_0 = arith.constant 0 : i32
    %2 = arith.cmpi ne, %1, %c0_i32_0 : i32
    scf.if %2 {
      %cst_10 = arith.constant 0.000000e+00 : f32
      %12 = vector.broadcast %cst_10 : f32 to vector<16x32xf32>
      %c0_11 = arith.constant 0 : index
      %c0_12 = arith.constant 0 : index
      %13 = vector.load %arg9[%c0_11, %c0_12] : memref<16x32xf32, #tpu.memory_space<vmem>>, vector<16x32xf32>
      tpu.vector_store %arg9[%c0_11, %c0_12], %12 {strides = array<i32>} : memref<16x32xf32, #tpu.memory_space<vmem>>, vector<16x32xf32>,
    } else {
    }
    %c0 = arith.constant 0 : index
    %c0_1 = arith.constant 0 : index
    %3 = vector.load %arg9[%c0, %c0_1] : memref<16x32xf32, #tpu.memory_space<vmem>>, vector<16x32xf32>
    %c0_2 = arith.constant 0 : index
    %c0_3 = arith.constant 0 : index
    %4 = vector.load %arg2[%c0_2, %c0_3] : memref<16x64xbf16, #tpu.memory_space<vmem>>, vector<16x64xbf16>
    %c0_4 = arith.constant 0 : index
    %c0_5 = arith.constant 0 : index
    %5 = vector.load %arg3[%c0_4, %c0_5] : memref<64x32xbf16, #tpu.memory_space<vmem>>, vector<64x32xbf16>
    %cst = arith.constant dense<0.000000e+00> : vector<16x32xf32>
    %6 = tpu.matmul %4, %5, %cst {dimension_numbers = #tpu.dot_dimension_numbers<[1], [0], [0], [1], [0, 0, 1, 1], [], []>} : vector<16x64xbf16>, vector<64x32xbf16>, vector<16x32xf32> -> vector<16x32xf32>
    %7 = arith.addf %3, %6 : vector<16x32xf32>
    %c0_6 = arith.constant 0 : index
    %c0_7 = arith.constant 0 : index
    %8 = vector.load %arg9[%c0_6, %c0_7] : memref<16x32xf32, #tpu.memory_space<vmem>>, vector<16x32xf32>
    tpu.vector_store %arg9[%c0_6, %c0_7], %7 {strides = array<i32>} : memref<16x32xf32, #tpu.memory_space<vmem>>, vector<16x32xf32>,
    %c0_i32_8 = arith.constant 0 : i32
    %9 = arith.cmpi eq, %arg1, %c0_i32_8 : i32
    %10 = arith.extui %9 : i1 to i32
    %c0_i32_9 = arith.constant 0 : i32
    %11 = arith.cmpi ne, %10, %c0_i32_9 : i32
    scf.if %11 {
      %c0_10 = arith.constant 0 : index
      %c0_11 = arith.constant 0 : index
      %12 = vector.load %arg9[%c0_10, %c0_11] : memref<16x32xf32, #tpu.memory_space<vmem>>, vector<16x32xf32>
      %c0_12 = arith.constant 0 : index
      %c0_13 = arith.constant 0 : index
      %13 = vector.load %arg4[%c0_12, %c0_13] : memref<1x32xf32, #tpu.memory_space<vmem>>, vector<1x32xf32>
      %14 = vector.broadcast %13 : vector<1x32xf32> to vector<16x32xf32>
      %15 = arith.addf %12, %14 : vector<16x32xf32>
      %c0_14 = arith.constant 0 : index
      %c0_15 = arith.constant 0 : index
      %16 = vector.load %arg5[%c0_14, %c0_15] : memref<16x32xbf16, #tpu.memory_space<vmem>>, vector<16x32xbf16>
      %17 = arith.extf %16 : vector<16x32xbf16> to vector<16x32xf32>
      %18 = arith.addf %15, %17 : vector<16x32xf32>
      %c0_16 = arith.constant 0 : index
      %c0_17 = arith.constant 0 : index
      %19 = vector.load %arg6[%c0_16, %c0_17] : memref<1x32xf32, #tpu.memory_space<vmem>>, vector<1x32xf32>
      %c0_18 = arith.constant 0 : index
      %c0_19 = arith.constant 0 : index
      %20 = vector.load %arg7[%c0_18, %c0_19] : memref<1x32xf32, #tpu.memory_space<vmem>>, vector<1x32xf32>
      %cst_20 = arith.constant dense<0.000000e+00> : vector<16xf32>
      %21 = vector.multi_reduction <add>, %18, %cst_20 [1] : vector<16x32xf32> to vector<16xf32>
      %22 = vector.shape_cast %21 : vector<16xf32> to vector<16x1xf32>
      %cst_21 = arith.constant 3.200000e+01 : f32
      %23 = vector.broadcast %cst_21 : f32 to vector<16x1xf32>
      %24 = arith.divf %22, %23 : vector<16x1xf32>
      %25 = vector.broadcast %24 : vector<16x1xf32> to vector<16x32xf32>
      %26 = arith.subf %18, %25 : vector<16x32xf32>
      %27 = arith.mulf %26, %26 : vector<16x32xf32>
      %cst_22 = arith.constant dense<0.000000e+00> : vector<16xf32>
      %28 = vector.multi_reduction <add>, %27, %cst_22 [1] : vector<16x32xf32> to vector<16xf32>
      %29 = vector.shape_cast %28 : vector<16xf32> to vector<16x1xf32>
      %cst_23 = arith.constant 3.200000e+01 : f32
      %30 = vector.broadcast %cst_23 : f32 to vector<16x1xf32>
      %31 = arith.divf %29, %30 : vector<16x1xf32>
      %32 = vector.broadcast %24 : vector<16x1xf32> to vector<16x32xf32>
      %33 = arith.subf %18, %32 : vector<16x32xf32>
      %cst_24 = arith.constant 9.99999996E-13 : f32
      %34 = vector.broadcast %cst_24 : f32 to vector<16x1xf32>
      %35 = arith.addf %31, %34 : vector<16x1xf32>
      %36 = math.rsqrt %35 : vector<16x1xf32>
      %37 = vector.broadcast %36 : vector<16x1xf32> to vector<16x32xf32>
      %38 = arith.mulf %33, %37 : vector<16x32xf32>
      %39 = vector.broadcast %19 : vector<1x32xf32> to vector<16x32xf32>
      %40 = arith.mulf %38, %39 : vector<16x32xf32>
      %41 = vector.broadcast %20 : vector<1x32xf32> to vector<16x32xf32>
      %42 = arith.addf %40, %41 : vector<16x32xf32>
      %43 = arith.truncf %42 : vector<16x32xf32> to vector<16x32xbf16>
      %c0_25 = arith.constant 0 : index
      %c0_26 = arith.constant 0 : index
      %44 = vector.load %arg8[%c0_25, %c0_26] : memref<16x32xbf16, #tpu.memory_space<vmem>>, vector<16x32xbf16>
      tpu.vector_store %arg8[%c0_25, %c0_26], %43 {strides = array<i32>} : memref<16x32xbf16, #tpu.memory_space<vmem>>, vector<16x32xbf16>,
    } else {
    }
    return
  }
  func.func @transform_0(%arg0: i32, %arg1: i32) -> (i32, i32) {
    %c0_i32 = arith.constant 0 : i32
    return %arg0, %arg1 : i32, i32
  }
  func.func @transform_1(%arg0: i32, %arg1: i32) -> (i32, i32) {
    %c0_i32 = arith.constant 0 : i32
    %c0_i32_0 = arith.constant 0 : i32
    return %arg1, %c0_i32 : i32, i32
  }
  func.func @transform_2(%arg0: i32, %arg1: i32) -> (i32, i32) {
    %c0_i32 = arith.constant 0 : i32
    %c0_i32_0 = arith.constant 0 : i32
    %c0_i32_1 = arith.constant 0 : i32
    return %c0_i32, %c0_i32_0 : i32, i32
  }
  func.func @transform_3(%arg0: i32, %arg1: i32) -> (i32, i32) {
    %c0_i32 = arith.constant 0 : i32
    %c0_i32_0 = arith.constant 0 : i32
    return %arg0, %c0_i32 : i32, i32
  }
  func.func @transform_4(%arg0: i32, %arg1: i32) -> (i32, i32) {
    %c0_i32 = arith.constant 0 : i32
    %c0_i32_0 = arith.constant 0 : i32
    %c0_i32_1 = arith.constant 0 : i32
    return %c0_i32, %c0_i32_0 : i32, i32
  }
  func.func @transform_5(%arg0: i32, %arg1: i32) -> (i32, i32) {
    %c0_i32 = arith.constant 0 : i32
    %c0_i32_0 = arith.constant 0 : i32
    %c0_i32_1 = arith.constant 0 : i32
    return %c0_i32, %c0_i32_0 : i32, i32
  }
  func.func @transform_6(%arg0: i32, %arg1: i32) -> (i32, i32) {
    %c0_i32 = arith.constant 0 : i32
    %c0_i32_0 = arith.constant 0 : i32
    return %arg0, %c0_i32 : i32, i32
  }
}

module attributes {stable_mosaic.version = 11 : i64} {
  func.func @kernel(%arg0: i32, %arg1: i32, %arg2: i32, %arg3: memref<2x32xbf16, #tpu.memory_space<vmem>>, %arg4: memref<32x128xbf16, #tpu.memory_space<vmem>>, %arg5: memref<1x128xf32, #tpu.memory_space<vmem>>, %arg6: memref<2x128xf32, #tpu.memory_space<vmem>>, %arg7: memref<2x128xf32, #tpu.memory_space<vmem>>) attributes {dimension_semantics = [#tpu.dimension_semantics<parallel>, #tpu.dimension_semantics<parallel>, #tpu.dimension_semantics<arbitrary>], iteration_bounds = array<i64: 1, 1, 1>, scalar_prefetch = 0 : i64, scratch_operands = 1 : i64, tpu.core_type = #tpu.core_type<tc>, window_params = [{transform_indices = @transform_0, window_bounds = array<i64: 2, 32>}, {transform_indices = @transform_1, window_bounds = array<i64: 32, 128>}, {transform_indices = @transform_2, window_bounds = array<i64: 1, 128>}, {transform_indices = @transform_3, window_bounds = array<i64: 2, 128>}]} {
    %c0_i32 = arith.constant 0 : i32
    %0 = arith.cmpi eq, %arg2, %c0_i32 : i32
    %1 = arith.extui %0 : i1 to i32
    %c0_i32_0 = arith.constant 0 : i32
    %2 = arith.cmpi ne, %1, %c0_i32_0 : i32
    scf.if %2 {
      %cst_10 = arith.constant 0.000000e+00 : f32
      %12 = vector.broadcast %cst_10 : f32 to vector<2x128xf32>
      %c0_11 = arith.constant 0 : index
      %c0_12 = arith.constant 0 : index
      %13 = vector.load %arg7[%c0_11, %c0_12] : memref<2x128xf32, #tpu.memory_space<vmem>>, vector<2x128xf32>
      tpu.vector_store %arg7[%c0_11, %c0_12], %12 {strides = array<i32>} : memref<2x128xf32, #tpu.memory_space<vmem>>, vector<2x128xf32>,
    } else {
    }
    %c0 = arith.constant 0 : index
    %c0_1 = arith.constant 0 : index
    %3 = vector.load %arg7[%c0, %c0_1] : memref<2x128xf32, #tpu.memory_space<vmem>>, vector<2x128xf32>
    %c0_2 = arith.constant 0 : index
    %c0_3 = arith.constant 0 : index
    %4 = vector.load %arg3[%c0_2, %c0_3] : memref<2x32xbf16, #tpu.memory_space<vmem>>, vector<2x32xbf16>
    %c0_4 = arith.constant 0 : index
    %c0_5 = arith.constant 0 : index
    %5 = vector.load %arg4[%c0_4, %c0_5] : memref<32x128xbf16, #tpu.memory_space<vmem>>, vector<32x128xbf16>
    %cst = arith.constant dense<0.000000e+00> : vector<2x128xf32>
    %6 = tpu.matmul %4, %5, %cst {dimension_numbers = #tpu.dot_dimension_numbers<[1], [0], [0], [1], [0, 0, 1, 1], [], []>} : vector<2x32xbf16>, vector<32x128xbf16>, vector<2x128xf32> -> vector<2x128xf32>
    %7 = arith.addf %3, %6 : vector<2x128xf32>
    %c0_6 = arith.constant 0 : index
    %c0_7 = arith.constant 0 : index
    %8 = vector.load %arg7[%c0_6, %c0_7] : memref<2x128xf32, #tpu.memory_space<vmem>>, vector<2x128xf32>
    tpu.vector_store %arg7[%c0_6, %c0_7], %7 {strides = array<i32>} : memref<2x128xf32, #tpu.memory_space<vmem>>, vector<2x128xf32>,
    %c0_i32_8 = arith.constant 0 : i32
    %9 = arith.cmpi eq, %arg2, %c0_i32_8 : i32
    %10 = arith.extui %9 : i1 to i32
    %c0_i32_9 = arith.constant 0 : i32
    %11 = arith.cmpi ne, %10, %c0_i32_9 : i32
    scf.if %11 {
      %c0_10 = arith.constant 0 : index
      %c0_11 = arith.constant 0 : index
      %12 = vector.load %arg7[%c0_10, %c0_11] : memref<2x128xf32, #tpu.memory_space<vmem>>, vector<2x128xf32>
      %c0_12 = arith.constant 0 : index
      %c0_13 = arith.constant 0 : index
      %13 = vector.load %arg5[%c0_12, %c0_13] : memref<1x128xf32, #tpu.memory_space<vmem>>, vector<1x128xf32>
      %14 = vector.broadcast %13 : vector<1x128xf32> to vector<2x128xf32>
      %15 = arith.addf %12, %14 : vector<2x128xf32>
      %c0_14 = arith.constant 0 : index
      %c0_15 = arith.constant 0 : index
      %16 = vector.load %arg6[%c0_14, %c0_15] : memref<2x128xf32, #tpu.memory_space<vmem>>, vector<2x128xf32>
      tpu.vector_store %arg6[%c0_14, %c0_15], %15 {strides = array<i32>} : memref<2x128xf32, #tpu.memory_space<vmem>>, vector<2x128xf32>,
    } else {
    }
    return
  }
  func.func @transform_0(%arg0: i32, %arg1: i32, %arg2: i32) -> (i32, i32) {
    %c0_i32 = arith.constant 0 : i32
    return %arg0, %arg2 : i32, i32
  }
  func.func @transform_1(%arg0: i32, %arg1: i32, %arg2: i32) -> (i32, i32) {
    %c0_i32 = arith.constant 0 : i32
    return %arg2, %arg1 : i32, i32
  }
  func.func @transform_2(%arg0: i32, %arg1: i32, %arg2: i32) -> (i32, i32) {
    %c0_i32 = arith.constant 0 : i32
    %c0_i32_0 = arith.constant 0 : i32
    return %c0_i32, %arg1 : i32, i32
  }
  func.func @transform_3(%arg0: i32, %arg1: i32, %arg2: i32) -> (i32, i32) {
    %c0_i32 = arith.constant 0 : i32
    return %arg0, %arg1 : i32, i32
  }
}

module attributes {stable_mosaic.version = 11 : i64} {
  func.func @kernel(%arg0: i32, %arg1: i32, %arg2: i32, %arg3: memref<2x32xbf16, #tpu.memory_space<vmem>>, %arg4: memref<32x32xbf16, #tpu.memory_space<vmem>>, %arg5: memref<1x32xf32, #tpu.memory_space<vmem>>, %arg6: memref<2x32xbf16, #tpu.memory_space<vmem>>, %arg7: memref<2x32xf32, #tpu.memory_space<vmem>>) attributes {dimension_semantics = [#tpu.dimension_semantics<parallel>, #tpu.dimension_semantics<parallel>, #tpu.dimension_semantics<arbitrary>], iteration_bounds = array<i64: 1, 1, 1>, scalar_prefetch = 0 : i64, scratch_operands = 1 : i64, tpu.core_type = #tpu.core_type<tc>, window_params = [{transform_indices = @transform_0, window_bounds = array<i64: 2, 32>}, {transform_indices = @transform_1, window_bounds = array<i64: 32, 32>}, {transform_indices = @transform_2, window_bounds = array<i64: 1, 32>}, {transform_indices = @transform_3, window_bounds = array<i64: 2, 32>}]} {
    %c0_i32 = arith.constant 0 : i32
    %0 = arith.cmpi eq, %arg2, %c0_i32 : i32
    %1 = arith.extui %0 : i1 to i32
    %c0_i32_0 = arith.constant 0 : i32
    %2 = arith.cmpi ne, %1, %c0_i32_0 : i32
    scf.if %2 {
      %cst_10 = arith.constant 0.000000e+00 : f32
      %12 = vector.broadcast %cst_10 : f32 to vector<2x32xf32>
      %c0_11 = arith.constant 0 : index
      %c0_12 = arith.constant 0 : index
      %13 = vector.load %arg7[%c0_11, %c0_12] : memref<2x32xf32, #tpu.memory_space<vmem>>, vector<2x32xf32>
      tpu.vector_store %arg7[%c0_11, %c0_12], %12 {strides = array<i32>} : memref<2x32xf32, #tpu.memory_space<vmem>>, vector<2x32xf32>,
    } else {
    }
    %c0 = arith.constant 0 : index
    %c0_1 = arith.constant 0 : index
    %3 = vector.load %arg7[%c0, %c0_1] : memref<2x32xf32, #tpu.memory_space<vmem>>, vector<2x32xf32>
    %c0_2 = arith.constant 0 : index
    %c0_3 = arith.constant 0 : index
    %4 = vector.load %arg3[%c0_2, %c0_3] : memref<2x32xbf16, #tpu.memory_space<vmem>>, vector<2x32xbf16>
    %c0_4 = arith.constant 0 : index
    %c0_5 = arith.constant 0 : index
    %5 = vector.load %arg4[%c0_4, %c0_5] : memref<32x32xbf16, #tpu.memory_space<vmem>>, vector<32x32xbf16>
    %cst = arith.constant dense<0.000000e+00> : vector<2x32xf32>
    %6 = tpu.matmul %4, %5, %cst {dimension_numbers = #tpu.dot_dimension_numbers<[1], [0], [0], [1], [0, 0, 1, 1], [], []>} : vector<2x32xbf16>, vector<32x32xbf16>, vector<2x32xf32> -> vector<2x32xf32>
    %7 = arith.addf %3, %6 : vector<2x32xf32>
    %c0_6 = arith.constant 0 : index
    %c0_7 = arith.constant 0 : index
    %8 = vector.load %arg7[%c0_6, %c0_7] : memref<2x32xf32, #tpu.memory_space<vmem>>, vector<2x32xf32>
    tpu.vector_store %arg7[%c0_6, %c0_7], %7 {strides = array<i32>} : memref<2x32xf32, #tpu.memory_space<vmem>>, vector<2x32xf32>,
    %c0_i32_8 = arith.constant 0 : i32
    %9 = arith.cmpi eq, %arg2, %c0_i32_8 : i32
    %10 = arith.extui %9 : i1 to i32
    %c0_i32_9 = arith.constant 0 : i32
    %11 = arith.cmpi ne, %10, %c0_i32_9 : i32
    scf.if %11 {
      %c0_10 = arith.constant 0 : index
      %c0_11 = arith.constant 0 : index
      %12 = vector.load %arg7[%c0_10, %c0_11] : memref<2x32xf32, #tpu.memory_space<vmem>>, vector<2x32xf32>
      %c0_12 = arith.constant 0 : index
      %c0_13 = arith.constant 0 : index
      %13 = vector.load %arg5[%c0_12, %c0_13] : memref<1x32xf32, #tpu.memory_space<vmem>>, vector<1x32xf32>
      %14 = vector.broadcast %13 : vector<1x32xf32> to vector<2x32xf32>
      %15 = arith.addf %12, %14 : vector<2x32xf32>
      %16 = math.tanh %15 : vector<2x32xf32>
      %17 = arith.truncf %16 : vector<2x32xf32> to vector<2x32xbf16>
      %c0_14 = arith.constant 0 : index
      %c0_15 = arith.constant 0 : index
      %18 = vector.load %arg6[%c0_14, %c0_15] : memref<2x32xbf16, #tpu.memory_space<vmem>>, vector<2x32xbf16>
      tpu.vector_store %arg6[%c0_14, %c0_15], %17 {strides = array<i32>} : memref<2x32xbf16, #tpu.memory_space<vmem>>, vector<2x32xbf16>,
    } else {
    }
    return
  }
  func.func @transform_0(%arg0: i32, %arg1: i32, %arg2: i32) -> (i32, i32) {
    %c0_i32 = arith.constant 0 : i32
    return %arg0, %arg2 : i32, i32
  }
  func.func @transform_1(%arg0: i32, %arg1: i32, %arg2: i32) -> (i32, i32) {
    %c0_i32 = arith.constant 0 : i32
    return %arg2, %arg1 : i32, i32
  }
  func.func @transform_2(%arg0: i32, %arg1: i32, %arg2: i32) -> (i32, i32) {
    %c0_i32 = arith.constant 0 : i32
    %c0_i32_0 = arith.constant 0 : i32
    return %c0_i32, %arg1 : i32, i32
  }
  func.func @transform_3(%arg0: i32, %arg1: i32, %arg2: i32) -> (i32, i32) {
    %c0_i32 = arith.constant 0 : i32
    return %arg0, %arg1 : i32, i32
  }
}

</mosaic_0001>

<bundles_post_ra>
// kernel: _lambda_.13
= control target key start
LH: loop header
LB: loop body
LE: loop exit
PB: predicated region body
PF: predicated region fallthrough
CT: control target
= control target key end

     0   :  { %vm18_vm0 = vcmask 261120   ;;  %vm70_vm1 = vcmask 257024   ;;  %s129_s0 = inlined_call_operand.vmem [shape: f32[16,32], index: 0, kind: input, shape index: {}]   ;;  %s130_s1 = inlined_call_operand.vmem [shape: f32[1,32], index: 1, kind: input, shape index: {}]   ;;  %s131_s2 = inlined_call_operand.vmem [shape: f32[1,32], index: 2, kind: input, shape index: {}]   ;;  %s132_s3 = inlined_call_operand.vmem [shape: bf16[16,32], index: 3, kind: output, shape index: {}]  }
   0x1   :  { %v14_v0 = vld [vmem:[%s129_s0] sm:$0xff]  ;;  %v15_v1 = vld [vmem:[%s129_s0 + $0x8] sm:$0xff] }
   0x2   :  { %v19_v2 = vsel %vm18_vm0, %v14_v0, 0.0  ;;  %v22_v3 = vsel %vm18_vm0, %v15_v1, 0.0  ;;  %v77_v21 = vld [vmem:[%s130_s1] ss:$0 sm:$0xff] }
   0x3   :  { %20 = vadd.xlane.f32.xlu0 %v19_v2  ;;  %v78_v23 = vld [vmem:[%s131_s2] ss:$0 sm:$0xff] }
   0x7   :  { %23 = vadd.xlane.f32.xlu0 %v22_v3 }
  0x90   :  { %v21_v4 = vpop.xlane.xlu0 %20 }
  0x91   :  { %v26_v5 = vmul.f32 0.03125, %v21_v4 }
  0x93   :  { %v28_v6 = vsub.f32 %v14_v0, %v26_v5 }
  0x94   :  { %v24_v7 = vpop.xlane.xlu0 %23 }
  0x95   :  { %v27_v8 = vmul.f32 0.03125, %v24_v7  ;;  %v30_v9 = vmul.f32 %v28_v6, %v28_v6 }
  0x97   :  { %v29_v10 = vsub.f32 %v15_v1, %v27_v8  ;;  %v32_v11 = vsel %vm18_vm0, %v30_v9, 0.0 }
  0x98   :  { %33 = vadd.xlane.f32.xlu1 %v32_v11 }
  0x99   :  { %v31_v12 = vmul.f32 %v29_v10, %v29_v10 }
  0x9b   :  { %v35_v13 = vsel %vm18_vm0, %v31_v12, 0.0 }
  0x9c   :  { %36 = vadd.xlane.f32.xlu1 %v35_v13 }
 0x125   :  { %v34_v14 = vpop.xlane.xlu1 %33 }
 0x126   :  { %v38_v15 = vmul.f32 0.03125, %v34_v14 }
 0x128   :  { %v40_v16 = vadd.f32 1e-12, %v38_v15 }
 0x129   :  { %v37_v17 = vpop.xlane.xlu1 %36 }
 0x12a   :  { %83 = vrsqrt.f32 %v40_v16  ;;  %v39_v18 = vmul.f32 0.03125, %v37_v17 }
 0x12c   :  { %v41_v19 = vadd.f32 1e-12, %v39_v18 }
 0x12e   :  { %85 = vrsqrt.f32 %v41_v19 }
 0x134   :  { %v84_v20 = vpop.eup %83 }
 0x135   :  { %v44_v22 = vmul.f32 %v84_v20, %v28_v6 }
 0x137   :  { %v52_v24 = vmul.f32 %v77_v21, %v44_v22 }
 0x138   :  { %v86_v25 = vpop.eup %85 }
 0x139   :  { %v60_v26 = vadd.f32 %v78_v23, %v52_v24  ;;  %v45_v27 = vmul.f32 %v86_v25, %v29_v10 }
 0x13b   :  { %v81_v28 = vpack.c.bf16 %v60_v26, %v60_v26  ;;  %v53_v29 = vmul.f32 %v77_v21, %v45_v27 }
 0x13d   :  { %71 = vst.msk [vmem:[%s132_s3] sm:$0xf] %vm70_vm1, %v81_v28  ;;  %v61_v30 = vadd.f32 %v78_v23, %v53_v29 }
 0x13f   :  { %v82_v31 = vpack.c.bf16 %v61_v30, %v61_v30 }
 0x141   :  { %72 = vst.msk [vmem:[%s132_s3 + $0x4] sm:$0xf] %vm70_vm1, %v82_v31 }

// kernel: _lambda_.14
= control target key start
LH: loop header
LB: loop body
LE: loop exit
PB: predicated region body
PF: predicated region fallthrough
CT: control target
= control target key end

     0   :  { %vm19_vm0 = vcmask 785408   ;;  %v151_v0 = vmov 0.0   ;;  %vm152_vm1 = vmmov 0   ;;  %vm47_vm2 = vcmask 261120   ;;  %s195_s1 = inlined_call_operand.vmem [shape: bf16[32,96], index: 1, kind: input, shape index: {}]   ;;  %s196_s0 = inlined_call_operand.vmem [shape: bf16[16,32], index: 0, kind: input, shape index: {}]   ;;  %s197_s2 = inlined_call_operand.vmem [shape: f32[1,96], index: 2, kind: input, shape index: {}]   ;;  %s198_s3 = inlined_call_operand.vmem [shape: bf16[16,96], index: 3, kind: output, shape index: {}]  }
   0x1   :  { %138 = vmatprep.subr.bf16.mxu0 %v151_v0  ;;  %v148_v1 = vld [vmem:[%s195_s1] sm:$0xff]   ;;  %142 = vmatprep.mubr.msk.bf16.mxu0 %vm152_vm1, %v151_v0  ;;  %20 = vst.msk [vmem:[#allocation2] sm:$0xff] %vm19_vm0, %v151_v0  ;;  %21 = vst.msk [vmem:[#allocation2 + $0x8] sm:$0xff] %vm19_vm0, %v151_v0  ;;  %v149_v2 = vld [vmem:[%s195_s1 + $0x8] sm:$0xff]   ;;  %vm119_vm3 = vcmask 781312  }
   0x2   :  { %139 = vmatpush3.bf16.msra.mxu0 %v148_v1  ;;  %v150_v3 = vld [vmem:[%s196_s0] sm:$0xff]  }
   0x3   :  { %140 = vmatprep.subr.bf16.mxu0 %v151_v0  ;;  %v130_v12 = vld [vmem:[%s197_s2] ss:$0 sm:$0xff] }
   0x6   :  { %141 = vmatpush3.bf16.msra.mxu0 %v149_v2 }
   0x8   :  { %v22_v4 = vld [vmem:[#allocation2] sm:$0xff]  ;;  %v23_v6 = vld [vmem:[#allocation2 + $0x8] sm:$0xff] }
   0x9   :  { %143 = vmatmul.mubr.msk.bf16.vlgmr.msra.gmra.mrb[0].mxu0 %vm47_vm2, %v150_v3 }
  0xdc   :  { %v85_v5 = vpop.f32.mrb[0].mxu0 }
  0xdd   :  { %v92_v7 = vadd.f32 %v85_v5, %v22_v4  ;;  %v144_v8 = vpop.f32.mrb[1].mxu0 }
  0xde   :  { %v88_v9 = vpop.f32.mrb[2].mxu0 }
  0xdf   :  { %95 = vst.msk [vmem:[#allocation2] sm:$0xff] %vm19_vm0, %v92_v7  ;;  %v93_v10 = vadd.f32 %v88_v9, %v23_v6  ;;  %v145_v11 = vpop.f32.mrb[3].mxu0 }
  0xe1   :  { %96 = vst.msk [vmem:[#allocation2 + $0x8] sm:$0xff] %vm19_vm0, %v93_v10 }
  0xe6   :  { %v100_v13 = vld [vmem:[#allocation2] sm:$0xff] }
  0xe7   :  { %v109_v14 = vadd.f32 %v130_v12, %v100_v13 }
  0xe8   :  { %v101_v15 = vld [vmem:[#allocation2 + $0x8] sm:$0xff] }
  0xe9   :  { %v133_v16 = vpack.c.bf16 %v109_v14, %v109_v14  ;;  %v110_v17 = vadd.f32 %v130_v12, %v101_v15 }
  0xeb   :  { %120 = vst.msk [vmem:[%s198_s3] sm:$0xf] %vm119_vm3, %v133_v16  ;;  %v134_v18 = vpack.c.bf16 %v110_v17, %v110_v17 }
  0xed   :  { %121 = vst.msk [vmem:[%s198_s3 + $0x4] sm:$0xf] %vm119_vm3, %v134_v18 }

// kernel: _lambda_.16
= control target key start
LH: loop header
LB: loop body
LE: loop exit
PB: predicated region body
PF: predicated region fallthrough
CT: control target
= control target key end

     0   :  { %vm28_vm0 = vcmask 261120   ;;  %v220_v0 = vmov 0.0   ;;  %vm221_vm1 = vmmov 0   ;;  %vm178_vm2 = vcmask 257024   ;;  %s293_s1 = inlined_call_operand.vmem [shape: bf16[32,32], index: 1, kind: input, shape index: {}]   ;;  %s294_s0 = inlined_call_operand.vmem [shape: bf16[16,32], index: 0, kind: input, shape index: {}]   ;;  %s295_s3 = inlined_call_operand.vmem [shape: bf16[16,32], index: 3, kind: input, shape index: {}]   ;;  %s296_s2 = inlined_call_operand.vmem [shape: f32[1,32], index: 2, kind: input, shape index: {}]   ;;  %s297_s4 = inlined_call_operand.vmem [shape: f32[1,32], index: 4, kind: input, shape index: {}]   ;;  %s298_s5 = inlined_call_operand.vmem [shape: f32[1,32], index: 5, kind: input, shape index: {}]   ;;  %s299_s6 = inlined_call_operand.vmem [shape: bf16[16,32], index: 6, kind: output, shape index: {}]  }
   0x1   :  { %203 = vmatprep.subr.bf16.mxu0 %v220_v0  ;;  %v213_v1 = vld [vmem:[%s293_s1] sm:$0xff]   ;;  %207 = vmatprep.mubr.msk.bf16.mxu0 %vm221_vm1, %v220_v0  ;;  %29 = vst.msk [vmem:[#allocation2] sm:$0xff] %vm28_vm0, %v220_v0  ;;  %30 = vst.msk [vmem:[#allocation2 + $0x8] sm:$0xff] %vm28_vm0, %v220_v0  ;;  %v214_v2 = vld [vmem:[%s293_s1 + $0x8] sm:$0xff]  }
   0x2   :  { %204 = vmatpush3.bf16.msra.mxu0 %v213_v1  ;;  %v215_v3 = vld [vmem:[%s294_s0] sm:$0xff]  }
   0x3   :  { %205 = vmatprep.subr.bf16.mxu0 %v220_v0  ;;  %v197_v12 = vld [vmem:[%s295_s3] sm:$0xff]  }
   0x4   :  { %v189_v13 = vld [vmem:[%s296_s2] ss:$0 sm:$0xff]  ;;  %v198_v14 = vunpack.c.l.bf16 %v197_v12  ;;  %v199_v17 = vunpack.c.h.bf16 %v197_v12 }
   0x5   :  { %v190_v41 = vld [vmem:[%s297_s4] ss:$0 sm:$0xff] }
   0x6   :  { %206 = vmatpush3.bf16.msra.mxu0 %v214_v2  ;;  %v191_v43 = vld [vmem:[%s298_s5] ss:$0 sm:$0xff] }
   0x8   :  { %v31_v4 = vld [vmem:[#allocation2] sm:$0xff]  ;;  %v32_v6 = vld [vmem:[#allocation2 + $0x8] sm:$0xff] }
   0x9   :  { %208 = vmatmul.mubr.msk.bf16.vlgmr.msra.gmra.mrb[0].mxu0 %vm28_vm0, %v215_v3 }
  0xdc   :  { %v94_v5 = vpop.f32.mrb[0].mxu0 }
  0xdd   :  { %v101_v7 = vadd.f32 %v94_v5, %v31_v4  ;;  %v209_v8 = vpop.f32.mrb[1].mxu0 }
  0xde   :  { %v97_v9 = vpop.f32.mrb[2].mxu0 }
  0xdf   :  { %103 = vst.msk [vmem:[#allocation2] sm:$0xff] %vm28_vm0, %v101_v7  ;;  %v102_v10 = vadd.f32 %v97_v9, %v32_v6  ;;  %v210_v11 = vpop.f32.mrb[3].mxu0 }
  0xe1   :  { %104 = vst.msk [vmem:[#allocation2 + $0x8] sm:$0xff] %vm28_vm0, %v102_v10 }
  0xe6   :  { %v108_v15 = vld [vmem:[#allocation2] sm:$0xff] }
  0xe7   :  { %v117_v16 = vadd.f32 %v189_v13, %v108_v15 }
  0xe8   :  { %v109_v18 = vld [vmem:[#allocation2 + $0x8] sm:$0xff] }
  0xe9   :  { %v123_v19 = vadd.f32 %v198_v14, %v117_v16  ;;  %v118_v20 = vadd.f32 %v189_v13, %v109_v18 }
  0xeb   :  { %v127_v21 = vsel %vm28_vm0, %v123_v19, 0.0  ;;  %v124_v22 = vadd.f32 %v199_v17, %v118_v20 }
  0xec   :  { %128 = vadd.xlane.f32.xlu0 %v127_v21 }
  0xed   :  { %v130_v23 = vsel %vm28_vm0, %v124_v22, 0.0 }
  0xf0   :  { %131 = vadd.xlane.f32.xlu0 %v130_v23 }
 0x179   :  { %v129_v24 = vpop.xlane.xlu0 %128 }
 0x17a   :  { %v134_v25 = vmul.f32 0.03125, %v129_v24 }
 0x17c   :  { %v136_v26 = vsub.f32 %v123_v19, %v134_v25 }
 0x17d   :  { %v132_v27 = vpop.xlane.xlu0 %131 }
 0x17e   :  { %v135_v28 = vmul.f32 0.03125, %v132_v27  ;;  %v138_v29 = vmul.f32 %v136_v26, %v136_v26 }
 0x180   :  { %v137_v30 = vsub.f32 %v124_v22, %v135_v28  ;;  %v140_v31 = vsel %vm28_vm0, %v138_v29, 0.0 }
 0x181   :  { %141 = vadd.xlane.f32.xlu1 %v140_v31 }
 0x182   :  { %v139_v32 = vmul.f32 %v137_v30, %v137_v30 }
 0x184   :  { %v143_v33 = vsel %vm28_vm0, %v139_v32, 0.0 }
 0x185   :  { %144 = vadd.xlane.f32.xlu1 %v143_v33 }
 0x20e   :  { %v142_v34 = vpop.xlane.xlu1 %141 }
 0x20f   :  { %v146_v35 = vmul.f32 0.03125, %v142_v34 }
 0x211   :  { %v148_v36 = vadd.f32 1e-12, %v146_v35 }
 0x212   :  { %v145_v37 = vpop.xlane.xlu1 %144 }
 0x213   :  { %216 = vrsqrt.f32 %v148_v36  ;;  %v147_v38 = vmul.f32 0.03125, %v145_v37 }
 0x215   :  { %v149_v39 = vadd.f32 1e-12, %v147_v38 }
 0x217   :  { %218 = vrsqrt.f32 %v149_v39 }
 0x21d   :  { %v217_v40 = vpop.eup %216 }
 0x21e   :  { %v152_v42 = vmul.f32 %v217_v40, %v136_v26 }
 0x220   :  { %v160_v44 = vmul.f32 %v190_v41, %v152_v42 }
 0x221   :  { %v219_v45 = vpop.eup %218 }
 0x222   :  { %v168_v46 = vadd.f32 %v191_v43, %v160_v44  ;;  %v153_v47 = vmul.f32 %v219_v45, %v137_v30 }
 0x224   :  { %v194_v48 = vpack.c.bf16 %v168_v46, %v168_v46  ;;  %v161_v49 = vmul.f32 %v190_v41, %v153_v47 }
 0x226   :  { %179 = vst.msk [vmem:[%s299_s6] sm:$0xf] %vm178_vm2, %v194_v48  ;;  %v169_v50 = vadd.f32 %v191_v43, %v161_v49 }
 0x228   :  { %v195_v51 = vpack.c.bf16 %v169_v50, %v169_v50 }
 0x22a   :  { %180 = vst.msk [vmem:[%s299_s6 + $0x4] sm:$0xf] %vm178_vm2, %v195_v51 }

// kernel: _lambda_.15
= control target key start
LH: loop header
LB: loop body
LE: loop exit
PB: predicated region body
PF: predicated region fallthrough
CT: control target
= control target key end

     0   :  { %s562_s9 = smov 0   ;;  %s614_s0 = inlined_call_operand.vmem [shape: bf16[16,96], index: 0, kind: input, shape index: {}]   ;;  %s615_s1 = inlined_call_operand.vmem [shape: f32[2,1,8], index: 1, kind: input, shape index: {}]   ;;  %s616_s2 = inlined_call_operand.vmem [shape: bf16[16,32], index: 2, kind: output, shape index: {}]  }
   0x1 LB: > { %s459_s10 = sadd.s32 4294967295, %s537_s9   ;;  %p463_p0 = scmp.ge.s32.totalorder %s537_s9, 1  ;;  %s537_s9 = sphi %s562_s9, %s12_s9  }
   0x2   : > { %p119_p1 = scmp.lt.s32.totalorder %s537_s9, 3 }
   0x4   : > { %p120_p2 = pnand %p463_p0, %p119_p1 }
   0x5   : > { %p142_p3 = scmp.lt.s32.totalorder (!%p120_p2), %s459_s10, 1  ;;  %v539_v0 = vmov (!%p120_p2), 0.0   ;;  %vm540_vm0 = vmmov (!%p120_p2), 0   ;;  %s541_s15 = smov (!%p120_p2), 96   ;;  %vm167_vm1 = vcmask (!%p120_p2), 130048   ;;  %vm214_vm2 = vcmask (!%p120_p2), 64512  }
   0x6   : > { %123 = sbr.rel (%p120_p2) target bundleno = 1541 (0x605), region = 28  ;;  %482 = vmatprep.subr.bf16.mxu0 (!%p120_p2), %v539_v0  ;;  %484 = vmatprep.mubr.msk.bf16.mxu0 (!%p120_p2), %vm540_vm0, %v539_v0  ;;  %s542_s16 = smov (!%p120_p2), 64   ;;  %vm232_vm3 = vcmask (!%p120_p2), 1043456   ;;  %vm395_vm4 = vcmask (!%p120_p2), 257024  }
   0x7   : > { %488 = vmatprep.subr.bf16.mxu1 (!%p120_p2), %v539_v0  ;;  %490 = vmatprep.mubr.msk.bf16.mxu1 (!%p120_p2), %vm540_vm0, %v539_v0  ;;  %s543_s20 = smov (!%p120_p2), 80   ;;  %s544_s21 = smov (!%p120_p2), 112  }
   0x8   : > { %s545_s22 = smov (!%p120_p2), 48   ;;  %s546_s23 = smov (!%p120_p2), 16  }
   0xd   : > { %s618_s10 = smov (!%p142_p3, %s459_s10), 1 }
   0xe   : > { %s464_s11 = sshll.u32 %s618_s10, 2  ;;  %s148_s19 = scalar_lea.vmem %s615_s1, %s618_s10 }
   0xf   : > { %s145_s14 = scalar_lea.vmem %s614_s0, %s464_s11  ;;  %v466_v5 = vld [vmem:[%s148_s19] ss:$0 sm:$0xff]  ;;  %s152_s26 = scalar_lea.vmem %s616_s2, %s464_s11 }
  0x10   : > { %v154_v1 = vld [vmem:[%s145_s14] sm:$0xf] }
  0x11   : > { %v580_v2 = vcombine.low %v154_v1, %v154_v1 }
  0x13   : > { %165 = vrot.lane.b32.xlu0 %v580_v2, %s541_s15  ;;  %227 = vrot.lane.b32.xlu1 %v580_v2, %s542_s16 }
  0x85   : > { %v166_v3 = vpop.permute.xlu0 %165  ;;  %v228_v12 = vpop.permute.xlu1 %227 }
  0x86   : > { %v172_v4 = vsel %vm167_vm1, %v166_v3, 0  ;;  %v234_v13 = vsel %vm232_vm3, %v228_v12, 0 }
  0x87   : > { %483 = vmatpush3.bf16.xpose.msra.mxu0 %v172_v4  ;;  %489 = vmatpush3.bf16.msra.mxu1 %v234_v13 }
  0x88   : > { %500 = vmatprep.subr.bf16.mxu0 %v539_v0  ;;  %494 = vmatprep.subr.bf16.mxu1 %v539_v0 }
  0x8e   : > { %485 = vmatmul.mubr.msk.bf16.vlgmr.msra.gmra.mrb[0].mxu0 %vm167_vm1, %v154_v1 }
  0x8f   : > { %502 = vmatprep.mubr.msk.bf16.mxu0 %vm540_vm0, %v539_v0 }
 0x161   : > { %v208_v6 = vpop.f32.mrb[0].mxu0 }
 0x162   : > { %v209_v7 = vadd.f32 %v466_v5, %v208_v6  ;;  %v486_v8 = vpop.f32.mrb[1].mxu0 }
 0x163   : > { %v211_v9 = vpop.f32.mrb[2].mxu0 }
 0x164   : > { %v487_v10 = vpop.f32.mrb[3].mxu0  ;;  %v215_v11 = vsel %vm214_vm2, %v209_v7, -inf }
 0x165   : > { %216 = vmax.xlane.f32.xlu0 %v215_v11 }
 0x1f2   : > { %v217_v14 = vpop.xlane.xlu0 %216 }
 0x1f3   : > { %v218_v15 = vsub.f32 %v209_v7, %v217_v14 }
 0x1f5   : > { %v219_v16 = vmul.f32 1.442695, %v218_v15 }
 0x1f7   : > { %523 = vpow2.f32 %v219_v16 }
 0x201   : > { %v524_v17 = vpop.eup %523 }
 0x202   : > { %v221_v18 = vsel %vm214_vm2, %v524_v17, 0.0 }
 0x203   : > { %222 = vadd.xlane.f32.xlu1 %v221_v18 }
 0x214   : > { %279 = vrot.lane.b32.xlu1 %v580_v2, %s543_s20 }
 0x218   : > { %277 = vrot.lane.b32.xlu1 %v580_v2, %s544_s21 }
 0x290   : > { %v223_v19 = vpop.xlane.xlu1 %222 }
 0x291   : > { %525 = vrcp.f32 %v223_v19 }
 0x294   : > { %v280_v21 = vpop.permute.xlu1 %279 }
 0x295   : > { %v285_v23 = vsel %vm167_vm1, %v280_v21, 0 }
 0x298   : > { %v278_v25 = vpop.permute.xlu1 %277 }
 0x29b   : > { %v526_v20 = vpop.eup %525 }
 0x29c   : > { %v225_v22 = vmul.f32 %v526_v20, %v524_v17 }
 0x29e   : > { %v226_v24 = vpack.c.bf16 %v225_v22, %v225_v22 }
 0x2a0   : > { %491 = vmatmul.mubr.msk.bf16.vlgmr.msra.gmra.mrb[0].mxu1 %vm214_vm2, %v226_v24 }
 0x2a1   : > { %495 = vmatpush3.bf16.xpose.msra.mxu1 %v285_v23  ;;  %496 = vmatprep.mubr.msk.bf16.mxu1 %vm540_vm0, %v539_v0 }
 0x2a8   : > { %497 = vmatmul.mubr.msk.bf16.vlgmr.msra.gmra.mrb[4].mxu1 %vm167_vm1, %v278_v25 }
 0x373   : > { %v270_v26 = vpop.f32.mrb[0].mxu1 }
 0x374   : > { %v492_v27 = vpop.f32.mrb[1].mxu1  ;;  %v276_v52 = vpack.c.bf16 %v270_v26, %v270_v26 }
 0x375   : > { %v273_v28 = vpop.f32.mrb[2].mxu1 }
 0x376   : > { %v493_v29 = vpop.f32.mrb[3].mxu1 }
 0x37b   : > { %v321_v30 = vpop.f32.mrb[4].mxu1 }
 0x37c   : > { %v322_v31 = vadd.f32 %v466_v5, %v321_v30  ;;  %v498_v32 = vpop.f32.mrb[5].mxu1 }
 0x37d   : > { %v324_v33 = vpop.f32.mrb[6].mxu1 }
 0x37e   : > { %v499_v34 = vpop.f32.mrb[7].mxu1  ;;  %v327_v35 = vsel %vm214_vm2, %v322_v31, -inf }
 0x37f   : > { %328 = vmax.xlane.f32.xlu1 %v327_v35 }
 0x40c   : > { %v329_v36 = vpop.xlane.xlu1 %328 }
 0x40d   : > { %v330_v37 = vsub.f32 %v322_v31, %v329_v36 }
 0x40f   : > { %v331_v38 = vmul.f32 1.442695, %v330_v37 }
 0x411   : > { %527 = vpow2.f32 %v331_v38 }
 0x41b   : > { %v528_v39 = vpop.eup %527 }
 0x41c   : > { %v333_v40 = vsel %vm214_vm2, %v528_v39, 0.0 }
 0x41d   : > { %334 = vadd.xlane.f32.xlu0 %v333_v40 }
 0x433   : > { %339 = vrot.lane.b32.xlu0 %v580_v2, %s545_s22 }
 0x4aa   : > { %v335_v41 = vpop.xlane.xlu0 %334 }
 0x4ab   : > { %529 = vrcp.f32 %v335_v41 }
 0x4ae   : > { %v340_v42 = vpop.permute.xlu0 %339 }
 0x4af   : > { %v345_v43 = vsel %vm232_vm3, %v340_v42, 0 }
 0x4b0   : > { %501 = vmatpush3.bf16.msra.mxu0 %v345_v43 }
 0x4b5   : > { %v530_v44 = vpop.eup %529 }
 0x4b6   : > { %v337_v45 = vmul.f32 %v530_v44, %v528_v39 }
 0x4b8   : > { %v338_v46 = vpack.c.bf16 %v337_v45, %v337_v45 }
 0x4ba   : > { %503 = vmatmul.mubr.msk.bf16.vlgmr.msra.gmra.mrb[4].mxu0 %vm214_vm2, %v338_v46 }
 0x58d   : > { %v381_v47 = vpop.f32.mrb[4].mxu0 }
 0x58e   : > { %v387_v48 = vpack.c.bf16 %v381_v47, %v381_v47  ;;  %v504_v49 = vpop.f32.mrb[5].mxu0 }
 0x58f   : > { %v384_v50 = vpop.f32.mrb[6].mxu0 }
 0x590   : > { %389 = vrot.lane.b32.xlu0 %v387_v48, %s546_s23  ;;  %v505_v51 = vpop.f32.mrb[7].mxu0 }
 0x602   : > { %v390_v53 = vpop.permute.xlu0 %389 }
 0x603   : > { %v393_v54 = vsel %vm167_vm1, %v276_v52, %v390_v53 }
 0x604   : > { %396 = vst.msk [vmem:[%s152_s26] sm:$0xf] %vm395_vm4, %v393_v54 }
 0x605 PF: > { %s12_s9 = sadd.s32 1, %s537_s9  }
 0x606   : > { %p9_p4 = scmp.ge.s32.totalorder %s12_s9, 4  }
 0x608   :  { %11 = sbr.rel (!%p9_p4) target bundleno = 1 (0x1), region = 61 }

// kernel: _lambda_.17
= control target key start
LH: loop header
LB: loop body
LE: loop exit
PB: predicated region body
PF: predicated region fallthrough
CT: control target
= control target key end

     0   :  { %vm19_vm0 = vcmask 523264   ;;  %v173_v0 = vmov 0.0   ;;  %vm174_vm1 = vmmov 0   ;;  %vm47_vm2 = vcmask 261120   ;;  %s217_s1 = inlined_call_operand.vmem [shape: bf16[32,64], index: 1, kind: input, shape index: {}]   ;;  %s218_s0 = inlined_call_operand.vmem [shape: bf16[16,32], index: 0, kind: input, shape index: {}]   ;;  %s219_s2 = inlined_call_operand.vmem [shape: f32[1,64], index: 2, kind: input, shape index: {}]   ;;  %s220_s3 = inlined_call_operand.vmem [shape: bf16[16,64], index: 3, kind: output, shape index: {}]  }
   0x1   :  { %156 = vmatprep.subr.bf16.mxu0 %v173_v0  ;;  %v166_v1 = vld [vmem:[%s217_s1] sm:$0xff]   ;;  %160 = vmatprep.mubr.msk.bf16.mxu0 %vm174_vm1, %v173_v0  ;;  %20 = vst.msk [vmem:[#allocation2] sm:$0xff] %vm19_vm0, %v173_v0  ;;  %21 = vst.msk [vmem:[#allocation2 + $0x8] sm:$0xff] %vm19_vm0, %v173_v0  ;;  %v167_v2 = vld [vmem:[%s217_s1 + $0x8] sm:$0xff]   ;;  %vm137_vm3 = vcmask 519168  }
   0x2   :  { %157 = vmatpush3.bf16.msra.mxu0 %v166_v1  ;;  %v168_v3 = vld [vmem:[%s218_s0] sm:$0xff]  }
   0x3   :  { %158 = vmatprep.subr.bf16.mxu0 %v173_v0  ;;  %v148_v12 = vld [vmem:[%s219_s2] ss:$0 sm:$0xff] }
   0x6   :  { %159 = vmatpush3.bf16.msra.mxu0 %v167_v2 }
   0x8   :  { %v22_v4 = vld [vmem:[#allocation2] sm:$0xff]  ;;  %v23_v6 = vld [vmem:[#allocation2 + $0x8] sm:$0xff] }
   0x9   :  { %161 = vmatmul.mubr.msk.bf16.vlgmr.msra.gmra.mrb[0].mxu0 %vm47_vm2, %v168_v3 }
  0xdc   :  { %v85_v5 = vpop.f32.mrb[0].mxu0 }
  0xdd   :  { %v92_v7 = vadd.f32 %v85_v5, %v22_v4  ;;  %v162_v8 = vpop.f32.mrb[1].mxu0 }
  0xde   :  { %v88_v9 = vpop.f32.mrb[2].mxu0 }
  0xdf   :  { %95 = vst.msk [vmem:[#allocation2] sm:$0xff] %vm19_vm0, %v92_v7  ;;  %v93_v10 = vadd.f32 %v88_v9, %v23_v6  ;;  %v163_v11 = vpop.f32.mrb[3].mxu0 }
  0xe1   :  { %96 = vst.msk [vmem:[#allocation2 + $0x8] sm:$0xff] %vm19_vm0, %v93_v10 }
  0xe6   :  { %v100_v13 = vld [vmem:[#allocation2] sm:$0xff] }
  0xe7   :  { %v109_v14 = vadd.f32 %v148_v12, %v100_v13 }
  0xe8   :  { %v101_v15 = vld [vmem:[#allocation2 + $0x8] sm:$0xff] }
  0xe9   :  { %v113_v16 = vmul.f32 0.044715, %v109_v14  ;;  %v110_v17 = vadd.f32 %v148_v12, %v101_v15  ;;  %v111_v28 = vmul.f32 0.5, %v109_v14 }
  0xeb   :  { %v115_v18 = vmul.f32 %v113_v16, %v109_v14  ;;  %v114_v19 = vmul.f32 0.044715, %v110_v17  ;;  %v112_v32 = vmul.f32 0.5, %v110_v17 }
  0xed   :  { %v117_v20 = vmul.f32 %v115_v18, %v109_v14  ;;  %v116_v21 = vmul.f32 %v114_v19, %v110_v17 }
  0xef   :  { %v119_v22 = vadd.f32 %v117_v20, %v109_v14  ;;  %v118_v23 = vmul.f32 %v116_v21, %v110_v17 }
  0xf1   :  { %v121_v24 = vmul.f32 0.7978846, %v119_v22  ;;  %v120_v25 = vadd.f32 %v118_v23, %v110_v17 }
  0xf3   :  { %169 = vtanh.f32 %v121_v24  ;;  %v122_v26 = vmul.f32 0.7978846, %v120_v25 }
  0xf5   :  { %171 = vtanh.f32 %v122_v26 }
  0xfd   :  { %v170_v27 = vpop.eup %169 }
  0xfe   :  { %v125_v29 = vadd.f32 1.0, %v170_v27 }
  0xff   :  { %v172_v30 = vpop.eup %171 }
 0x100   :  { %v127_v31 = vmul.f32 %v125_v29, %v111_v28  ;;  %v126_v33 = vadd.f32 1.0, %v172_v30 }
 0x102   :  { %v151_v34 = vpack.c.bf16 %v127_v31, %v127_v31  ;;  %v128_v35 = vmul.f32 %v126_v33, %v112_v32 }
 0x104   :  { %138 = vst.msk [vmem:[%s220_s3] sm:$0xf] %vm137_vm3, %v151_v34  ;;  %v152_v36 = vpack.c.bf16 %v128_v35, %v128_v35 }
 0x106   :  { %139 = vst.msk [vmem:[%s220_s3 + $0x4] sm:$0xf] %vm137_vm3, %v152_v36 }

// kernel: _lambda_.18
= control target key start
LH: loop header
LB: loop body
LE: loop exit
PB: predicated region body
PF: predicated region fallthrough
CT: control target
= control target key end

     0   :  { %vm28_vm0 = vcmask 261120   ;;  %v247_v0 = vmov 0.0   ;;  %vm248_vm1 = vmmov 0   ;;  %vm72_vm2 = vcmask 523264   ;;  %s325_s1 = inlined_call_operand.vmem [shape: bf16[64,32], index: 1, kind: input, shape index: {}]   ;;  %s326_s0 = inlined_call_operand.vmem [shape: bf16[16,64], index: 0, kind: input, shape index: {}]   ;;  %s327_s3 = inlined_call_operand.vmem [shape: bf16[16,32], index: 3, kind: input, shape index: {}]   ;;  %s328_s2 = inlined_call_operand.vmem [shape: f32[1,32], index: 2, kind: input, shape index: {}]   ;;  %s329_s4 = inlined_call_operand.vmem [shape: f32[1,32], index: 4, kind: input, shape index: {}]   ;;  %s330_s5 = inlined_call_operand.vmem [shape: f32[1,32], index: 5, kind: input, shape index: {}]   ;;  %s331_s6 = inlined_call_operand.vmem [shape: bf16[16,32], index: 6, kind: output, shape index: {}]  }
   0x1   :  { %224 = vmatprep.subr.bf16.mxu0 %v247_v0  ;;  %v238_v1 = vld [vmem:[%s325_s1] sm:$0xff]   ;;  %232 = vmatprep.mubr.msk.bf16.mxu0 %vm248_vm1, %v247_v0  ;;  %29 = vst.msk [vmem:[#allocation2] sm:$0xff] %vm28_vm0, %v247_v0  ;;  %30 = vst.msk [vmem:[#allocation2 + $0x8] sm:$0xff] %vm28_vm0, %v247_v0  ;;  %v239_v2 = vld [vmem:[%s325_s1 + $0x8] sm:$0xff]   ;;  %vm195_vm3 = vcmask 257024  }
   0x2   :  { %225 = vmatpush3.bf16.msra.mxu0 %v238_v1  ;;  %v240_v3 = vld [vmem:[%s325_s1 + $0x10] sm:$0xff]   ;;  %v241_v4 = vld [vmem:[%s325_s1 + $0x18] sm:$0xff]   ;;  %v242_v5 = vld [vmem:[%s326_s0] sm:$0xff]  }
   0x3   :  { %226 = vmatprep.subr.bf16.mxu0 %v247_v0  ;;  %v216_v14 = vld [vmem:[%s327_s3] sm:$0xff]  }
   0x4   :  { %v208_v15 = vld [vmem:[%s328_s2] ss:$0 sm:$0xff]  ;;  %v217_v16 = vunpack.c.l.bf16 %v216_v14  ;;  %v218_v19 = vunpack.c.h.bf16 %v216_v14 }
   0x5   :  { %v209_v43 = vld [vmem:[%s329_s4] ss:$0 sm:$0xff] }
   0x6   :  { %227 = vmatpush3.bf16.msra.mxu0 %v239_v2  ;;  %v210_v45 = vld [vmem:[%s330_s5] ss:$0 sm:$0xff] }
   0x7   :  { %228 = vmatprep.subr.bf16.mxu0 %v247_v0 }
   0x8   :  { %v31_v6 = vld [vmem:[#allocation2] sm:$0xff]  ;;  %v32_v8 = vld [vmem:[#allocation2 + $0x8] sm:$0xff] }
   0xa   :  { %229 = vmatpush3.bf16.msra.mxu0 %v240_v3 }
   0xb   :  { %230 = vmatprep.subr.bf16.mxu0 %v247_v0 }
   0xe   :  { %231 = vmatpush3.bf16.msra.mxu0 %v241_v4 }
  0x11   :  { %233 = vmatmul.mubr.msk.bf16.vlgmr.msra.gmra.mrb[0].mxu0 %vm72_vm2, %v242_v5 }
  0xe4   :  { %v110_v7 = vpop.f32.mrb[0].mxu0 }
  0xe5   :  { %v117_v9 = vadd.f32 %v110_v7, %v31_v6  ;;  %v234_v10 = vpop.f32.mrb[1].mxu0 }
  0xe6   :  { %v113_v11 = vpop.f32.mrb[2].mxu0 }
  0xe7   :  { %120 = vst.msk [vmem:[#allocation2] sm:$0xff] %vm28_vm0, %v117_v9  ;;  %v118_v12 = vadd.f32 %v113_v11, %v32_v8  ;;  %v235_v13 = vpop.f32.mrb[3].mxu0 }
  0xe9   :  { %121 = vst.msk [vmem:[#allocation2 + $0x8] sm:$0xff] %vm28_vm0, %v118_v12 }
  0xee   :  { %v125_v17 = vld [vmem:[#allocation2] sm:$0xff] }
  0xef   :  { %v134_v18 = vadd.f32 %v208_v15, %v125_v17 }
  0xf0   :  { %v126_v20 = vld [vmem:[#allocation2 + $0x8] sm:$0xff] }
  0xf1   :  { %v140_v21 = vadd.f32 %v217_v16, %v134_v18  ;;  %v135_v22 = vadd.f32 %v208_v15, %v126_v20 }
  0xf3   :  { %v144_v23 = vsel %vm28_vm0, %v140_v21, 0.0  ;;  %v141_v24 = vadd.f32 %v218_v19, %v135_v22 }
  0xf4   :  { %145 = vadd.xlane.f32.xlu0 %v144_v23 }
  0xf5   :  { %v147_v25 = vsel %vm28_vm0, %v141_v24, 0.0 }
  0xf8   :  { %148 = vadd.xlane.f32.xlu0 %v147_v25 }
 0x181   :  { %v146_v26 = vpop.xlane.xlu0 %145 }
 0x182   :  { %v151_v27 = vmul.f32 0.03125, %v146_v26 }
 0x184   :  { %v153_v28 = vsub.f32 %v140_v21, %v151_v27 }
 0x185   :  { %v149_v29 = vpop.xlane.xlu0 %148 }
 0x186   :  { %v152_v30 = vmul.f32 0.03125, %v149_v29  ;;  %v155_v31 = vmul.f32 %v153_v28, %v153_v28 }
 0x188   :  { %v154_v32 = vsub.f32 %v141_v24, %v152_v30  ;;  %v157_v33 = vsel %vm28_vm0, %v155_v31, 0.0 }
 0x189   :  { %158 = vadd.xlane.f32.xlu1 %v157_v33 }
 0x18a   :  { %v156_v34 = vmul.f32 %v154_v32, %v154_v32 }
 0x18c   :  { %v160_v35 = vsel %vm28_vm0, %v156_v34, 0.0 }
 0x18d   :  { %161 = vadd.xlane.f32.xlu1 %v160_v35 }
 0x216   :  { %v159_v36 = vpop.xlane.xlu1 %158 }
 0x217   :  { %v163_v37 = vmul.f32 0.03125, %v159_v36 }
 0x219   :  { %v165_v38 = vadd.f32 1e-12, %v163_v37 }
 0x21a   :  { %v162_v39 = vpop.xlane.xlu1 %161 }
 0x21b   :  { %243 = vrsqrt.f32 %v165_v38  ;;  %v164_v40 = vmul.f32 0.03125, %v162_v39 }
 0x21d   :  { %v166_v41 = vadd.f32 1e-12, %v164_v40 }
 0x21f   :  { %245 = vrsqrt.f32 %v166_v41 }
 0x225   :  { %v244_v42 = vpop.eup %243 }
 0x226   :  { %v169_v44 = vmul.f32 %v244_v42, %v153_v28 }
 0x228   :  { %v177_v46 = vmul.f32 %v209_v43, %v169_v44 }
 0x229   :  { %v246_v47 = vpop.eup %245 }
 0x22a   :  { %v185_v48 = vadd.f32 %v210_v45, %v177_v46  ;;  %v170_v49 = vmul.f32 %v246_v47, %v154_v32 }
 0x22c   :  { %v213_v50 = vpack.c.bf16 %v185_v48, %v185_v48  ;;  %v178_v51 = vmul.f32 %v209_v43, %v170_v49 }
 0x22e   :  { %196 = vst.msk [vmem:[%s331_s6] sm:$0xf] %vm195_vm3, %v213_v50  ;;  %v186_v52 = vadd.f32 %v210_v45, %v178_v51 }
 0x230   :  { %v214_v53 = vpack.c.bf16 %v186_v52, %v186_v52 }
 0x232   :  { %197 = vst.msk [vmem:[%s331_s6 + $0x4] sm:$0xf] %vm195_vm3, %v214_v53 }

// kernel: _lambda_.25
= control target key start
LH: loop header
LB: loop body
LE: loop exit
PB: predicated region body
PF: predicated region fallthrough
CT: control target
= control target key end

     0   :  { %v156_v1 = vmov 0.0   ;;  %vm157_vm0 = vmmov 0   ;;  %s203_s0 = inlined_call_operand.vmem [shape: bf16[2,32], index: 0, kind: input, shape index: {}]   ;;  %s204_s1 = inlined_call_operand.vmem [shape: bf16[32,128], index: 1, kind: input, shape index: {}]   ;;  %s205_s2 = inlined_call_operand.vmem [shape: f32[1,128], index: 2, kind: input, shape index: {}]   ;;  %s206_s3 = inlined_call_operand.hbm [shape: f32[2,128], index: 3, kind: output, shape index: {}]  }
   0x1   :  { %v130_v0 = vld [vmem:[%s204_s1] sm:$0xff]   ;;  %119 = vmatprep.subr.bf16.mxu0 %v156_v1  ;;  %20 = vst [vmem:[#allocation2] sm:$0x3] %v156_v1  ;;  %v131_v2 = vld [vmem:[%s204_s1 + $0x8] sm:$0xff]   ;;  %123 = vmatprep.mubr.msk.bf16.mxu0 %vm157_vm0, %v156_v1 }
   0x2   :  { %120 = vmatpush3.bf16.msra.mxu0 %v130_v0 }
   0x3   :  { %8 = vsyncpa [#allocation4], 0  ;;  %121 = vmatprep.subr.bf16.mxu0 %v156_v1  ;;  %v22_v3 = vld [vmem:[%s203_s0] sm:$0x1]  ;;  %vm39_vm1 = vcmask 261120   ;;  %s158_s19 = smov [#allocation3]  }
   0x4   :  { %v115_v10 = vld [vmem:[%s205_s2] ss:$0 sm:$0xff]  ;;  %s104_s20 = sshll.u32 %s158_s19, 4  ;;  %s105_s20 = int_to_ptr.vmem [resolvable:$true] %s104_s20 }
   0x5   :  { %s132_s0 = scalar_lea.vmem %s105_s20, 32  ;;  %p137_p1 = scmp.lt.s32.totalorder %s105_s20, %s105_s20 }
   0x6   :  { %122 = vmatpush3.bf16.msra.mxu0 %v131_v2  ;;  %p133_p0 = scmp.ne.s32.totalorder %s105_s20, %s132_s0  ;;  %p138_p2 = scmp.lt.s32.totalorder %s132_s0, %s132_s0 }
   0x8   :  { %v21_v4 = vld [vmem:[#allocation2] sm:$0x3]  ;;  %p139_p3 = por %p138_p2, %p137_p1 }
   0x9   :  { %124 = vmatmul.mubr.msk.bf16.vlgmr.msra.gmra.mrb[0].mxu0 %vm39_vm1, %v22_v3 }
   0xa   :  { %p140_p4 = pnand %p139_p3, %p133_p0 }
  0xdc   :  { %v77_v5 = vpop.f32.mrb[0].mxu0 }
  0xdd   :  { %v83_v6 = vadd.f32 %v77_v5, %v21_v4  ;;  %v125_v7 = vpop.f32.mrb[1].mxu0 }
  0xde   :  { %v80_v8 = vpop.f32.mrb[2].mxu0 }
  0xdf   :  { %84 = vst [vmem:[#allocation2] sm:$0x3] %v83_v6  ;;  %v126_v9 = vpop.f32.mrb[3].mxu0 }
  0xe6   :  { %v88_v11 = vld [vmem:[#allocation2] sm:$0x3] }
  0xe7   :  { %v96_v12 = vadd.f32 %v115_v10, %v88_v11 }
  0xe9   :  { %97 = vst [vmem:[#allocation3] sm:$0x3] %v96_v12 }
  0xea   :  { %143 = shalt.err (!%p140_p4)
}
  0xeb   :  { %s144_s23 = scalar_lea.hbm %s206_s3, 32 }
  0xec   :  { %p145_p5 = scmp.ne.s32.totalorder %s206_s3, %s144_s23  ;;  %p148_p6 = scmp.lt.u32.totalorder %s144_s23, %s206_s3 }
  0xee   :  { %p150_p7 = pnand %p148_p6, %p145_p5 }
  0xf0   :  { %153 = shalt.err (!%p150_p7)
}
  0xf1   :  { %107 = dma.vmem_to_hbm [thread:$0]  %s105_s20, 32, %s206_s3, [#allocation4]  }
  0xf2   :  { %154 = dma.done.wait [#allocation4], 32  }
  0xf3   :  { %155 = vsyncadd [#allocation4], 4294967264 }
  0xf4   :  { %111 = vsyncpa [#allocation4], 1 }

// kernel: _lambda_.24
= control target key start
LH: loop header
LB: loop body
LE: loop exit
PB: predicated region body
PF: predicated region fallthrough
CT: control target
= control target key end

     0   :  { %vm19_vm0 = vcmask 254976   ;;  %v127_v0 = vmov 0.0   ;;  %vm128_vm1 = vmmov 0   ;;  %vm39_vm2 = vcmask 261120   ;;  %s166_s1 = inlined_call_operand.vmem [shape: bf16[32,32], index: 1, kind: input, shape index: {}]   ;;  %s167_s0 = inlined_call_operand.vmem [shape: bf16[2,32], index: 0, kind: input, shape index: {}]   ;;  %s168_s2 = inlined_call_operand.vmem [shape: f32[1,32], index: 2, kind: input, shape index: {}]   ;;  %s169_s3 = inlined_call_operand.vmem [shape: bf16[2,32], index: 3, kind: output, shape index: {}]  }
   0x1   :  { %20 = vst.msk [vmem:[#allocation2] sm:$0x3] %vm19_vm0, %v127_v0  ;;  %113 = vmatprep.subr.bf16.mxu0 %v127_v0  ;;  %v123_v1 = vld [vmem:[%s166_s1] sm:$0xff]   ;;  %117 = vmatprep.mubr.msk.bf16.mxu0 %vm128_vm1, %v127_v0  ;;  %v124_v2 = vld [vmem:[%s166_s1 + $0x8] sm:$0xff]   ;;  %vm100_vm3 = vcmask 253952  }
   0x2   :  { %114 = vmatpush3.bf16.msra.mxu0 %v123_v1  ;;  %v22_v3 = vld [vmem:[%s167_s0] sm:$0x1] }
   0x3   :  { %115 = vmatprep.subr.bf16.mxu0 %v127_v0  ;;  %v109_v10 = vld [vmem:[%s168_s2] ss:$0 sm:$0xff] }
   0x6   :  { %116 = vmatpush3.bf16.msra.mxu0 %v124_v2 }
   0x8   :  { %v21_v4 = vld [vmem:[#allocation2] sm:$0x3] }
   0x9   :  { %118 = vmatmul.mubr.msk.bf16.vlgmr.msra.gmra.mrb[0].mxu0 %vm39_vm2, %v22_v3 }
  0xdc   :  { %v77_v5 = vpop.f32.mrb[0].mxu0 }
  0xdd   :  { %v83_v6 = vadd.f32 %v77_v5, %v21_v4  ;;  %v119_v7 = vpop.f32.mrb[1].mxu0 }
  0xde   :  { %v80_v8 = vpop.f32.mrb[2].mxu0 }
  0xdf   :  { %85 = vst.msk [vmem:[#allocation2] sm:$0x3] %vm19_vm0, %v83_v6  ;;  %v120_v9 = vpop.f32.mrb[3].mxu0 }
  0xe6   :  { %v89_v11 = vld [vmem:[#allocation2] sm:$0x3] }
  0xe7   :  { %v97_v12 = vadd.f32 %v109_v10, %v89_v11 }
  0xe9   :  { %125 = vtanh.f32 %v97_v12 }
  0xf3   :  { %v126_v13 = vpop.eup %125 }
  0xf4   :  { %v99_v14 = vpack.c.bf16 %v126_v13, %v126_v13 }
  0xf6   :  { %101 = vst.msk [vmem:[%s169_s3] sm:$0x1] %vm100_vm3, %v99_v14 }

</bundles_post_ra>
